<compile_context>
chip_gen: v6e
topology: v6e:2x2x1
jax: 0.10.0
libtpu: 0.0.40
codegen_flags: <defaults>
</compile_context>

<pallas_src>
import jax
import jax.numpy as jnp
from jax.experimental import pallas as pl
from jax.experimental.pallas import tpu as pltpu


def make_textcnn_kernel(pad):
    def kernel(x_ref, w_ref, cb_ref, fcw_ref, fcb_ref, out_ref):
        xb = x_ref[...]                                   # (TB, W, D) float32
        TB, W, D = xb.shape
        w0 = w_ref[0, :].reshape(1, 1, D)                 # tap 0 weights
        w1 = w_ref[1, :].reshape(1, 1, D)                 # tap 1 weights
        b = cb_ref[0, 0]                                  # conv bias (SMEM scalar)

        def mish(v):                                      # x * tanh(softplus(x))
            return v * jnp.tanh(jnp.logaddexp(v, 0.0))

        # Interior conv outputs t = pad .. pad+W-2 (both taps in-bounds): combine the
        # taps on the VPU, then a SINGLE cross-lane reduce over the embedding dim.
        z = xb[:, :W - 1, :] * w0 + xb[:, 1:, :] * w1     # (TB, W-1, D)  VPU
        s_int = jnp.sum(z, axis=-1)                       # (TB, W-1)     one XLU reduce
        pooled = jnp.max(mish(s_int + b), axis=-1, keepdims=True)   # (TB, 1)

        if pad >= 1:
            # Boundary outputs with exactly one in-bounds tap: t = pad-1 and pad+W-1.
            e_lo = jnp.sum(xb[:, 0:1, :] * w1, axis=-1)        # (TB, 1)
            e_hi = jnp.sum(xb[:, W - 1:W, :] * w0, axis=-1)    # (TB, 1)
            pooled = jnp.maximum(pooled, mish(e_lo + b))
            pooled = jnp.maximum(pooled, mish(e_hi + b))
        if pad >= 2:
            # Outputs where every tap lands in the zero padding equal mish(bias);
            # precomputed on the host, read from SMEM.
            pooled = jnp.maximum(pooled, cb_ref[0, 1])

        # Dropout is identity in eval; Linear(Co*len(ks)=1, class_num) is an outer
        # product + bias on the VPU.
        out_ref[...] = pooled * fcw_ref[...] + fcb_ref[...]         # (TB, C)
    return kernel


def _round_up(v, m):
    return ((v + m - 1) // m) * m


def _pick_batch_tile(N, batch_tile):
    """Batch tile TB and step count nb.  Big tiles amortize the ~0.35us/step overhead;
    an even nb keeps both v7x TensorCores busy under dimension_semantics=('parallel',)."""
    if N <= batch_tile:
        return N, 1
    TB = max(8, (batch_tile // 8) * 8)                    # sublane-friendly
    nb = pl.cdiv(N, TB)
    if nb % 2:                                            # prefer an even step count
        nb += 1
        TB = max(8, _round_up(pl.cdiv(N, nb), 8))
        nb = pl.cdiv(N, TB)
    return TB, nb


def textcnn_forward(x, conv_w, conv_b, fc_w, fc_b, padding=2, batch_tile=1024):
    """x: (N, W, D) float embeddings. Returns (N, class_num) logits."""
    N, W, D = x.shape
    Co, Ci, f, Dk = conv_w.shape
    if not (Co == 1 and Ci == 1 and f == 2 and Dk == D and fc_w.shape[1] == Co):
        # TODO(synk): general TextCNN (kernel_num > 1 / several kernel sizes) would pack
        # all conv channels into one (TB*W, D) x (D, sum(Co)) MXU matmul per tap.
        raise NotImplementedError("kernel implements Co=1 with a single kernel size f=2")
    assert W >= f, "sequence length must be >= kernel size"
    C = fc_w.shape[0]

    TB, nb = _pick_batch_tile(N, batch_tile)
    Np = nb * TB
    x_in = x.astype(jnp.float32)
    if Np != N:
        # Benign zero rows; their (finite) logits are sliced off below.
        x_in = jnp.pad(x_in, ((0, Np - N), (0, 0), (0, 0)))

    # Parameters repacked for the kernel (all resident VMEM/SMEM, constant index maps).
    w = conv_w[0, 0].astype(jnp.float32)                  # (2, D)
    b = conv_b[0].astype(jnp.float32)
    mish_b = b * jnp.tanh(jnp.logaddexp(b, 0.0))          # value of all-padding columns
    cb = jnp.stack([b, mish_b]).reshape(1, 2)             # -> SMEM
    fcw = fc_w[:, 0].reshape(1, C).astype(jnp.float32)    # (1, C)
    fcb = fc_b.reshape(1, C).astype(jnp.float32)          # (1, C)

    out = pl.pallas_call(
        make_textcnn_kernel(padding),
        out_shape=jax.ShapeDtypeStruct((Np, C), jnp.float32),
        grid_spec=pltpu.PrefetchScalarGridSpec(
            num_scalar_prefetch=0,
            grid=(nb,),
            in_specs=[
                pl.BlockSpec((TB, W, D), lambda n: (n, 0, 0)),        # x batch tile
                pl.BlockSpec((2, D), lambda n: (0, 0)),               # conv taps
                pl.BlockSpec(memory_space=pltpu.MemorySpace.SMEM),    # [bias, mish(bias)]
                pl.BlockSpec((1, C), lambda n: (0, 0)),               # fc weight row
                pl.BlockSpec((1, C), lambda n: (0, 0)),               # fc bias
            ],
            out_specs=pl.BlockSpec((TB, C), lambda n: (n, 0)),
        ),
        compiler_params=pltpu.CompilerParams(
            dimension_semantics=("parallel",)),
    )(x_in, w, cb, fcw, fcb)
    return out[:N] if Np != N else out


if __name__ == "__main__":
    # Small shapes consistent with the module (embed_dim shrunk from 300 to 128).
    N, W, D = 64, 8, 128
    class_num = 2
    kernel_num = 1        # Co
    f = 2                 # kernel_sizes = [2]
    pad = 2               # Conv2d padding=(2, 0)

    key = jax.random.PRNGKey(0)
    kx, kw, kb, kfw, kfb = jax.random.split(key, 5)

    x = jax.random.normal(kx, (N, W, D), dtype=jnp.float32)             # embedded text
    conv_w = jax.random.normal(kw, (kernel_num, 1, f, D), dtype=jnp.float32) * 0.05
    conv_b = jax.random.normal(kb, (kernel_num,), dtype=jnp.float32) * 0.05
    fc_w = jax.random.normal(kfw, (class_num, kernel_num), dtype=jnp.float32) * 0.5
    fc_b = jax.random.normal(kfb, (class_num,), dtype=jnp.float32) * 0.5

    # batch_tile=16 -> 4 grid steps: exercises batch-tiled pipelining + megacore split.
    logits = textcnn_forward(x, conv_w, conv_b, fc_w, fc_b, padding=pad, batch_tile=16)
    jax.block_until_ready(logits)

    # Pure-JAX reference (mirrors the PyTorch forward in eval mode).
    xp = jnp.pad(x, ((0, 0), (pad, pad), (0, 0)))
    lout = W + 2 * pad - f + 1
    e = jnp.einsum('nwd,fd->nwf', xp, conv_w[0, 0],
                   precision=jax.lax.Precision.HIGHEST)
    conv = conv_b[0] + sum(e[:, j:j + lout, j] for j in range(f))        # (N, Lout)
    act = conv * jnp.tanh(jnp.logaddexp(conv, 0.0))
    pooled = jnp.max(act, axis=1, keepdims=True)                         # (N, 1)
    ref = pooled * fc_w[:, 0][None, :] + fc_b[None, :]

    assert jnp.allclose(logits, ref, atol=2e-3, rtol=2e-3), (logits, ref)
    print("KERNEL_OK")
</pallas_src>

<mosaic_0001>
module attributes {stable_mosaic.version = 11 : i64} {
  func.func @kernel(%arg0: i32, %arg1: memref<16x8x128xf32, #tpu.memory_space<vmem>>, %arg2: memref<2x128xf32, #tpu.memory_space<vmem>>, %arg3: memref<1x2xf32, #tpu.memory_space<smem>>, %arg4: memref<1x2xf32, #tpu.memory_space<vmem>>, %arg5: memref<1x2xf32, #tpu.memory_space<vmem>>, %arg6: memref<16x2xf32, #tpu.memory_space<vmem>>) attributes {dimension_semantics = [#tpu.dimension_semantics<parallel>], iteration_bounds = array<i64: 4>, scalar_prefetch = 0 : i64, scratch_operands = 0 : i64, tpu.core_type = #tpu.core_type<tc>, window_params = [{transform_indices = @transform_0, window_bounds = array<i64: 16, 8, 128>}, {pipeline_mode = #tpu.pipeline_mode<synchronous>, transform_indices = @transform_1, window_bounds = array<i64: 2, 128>}, {transform_indices = @transform_2, window_bounds = array<i64: 1, 2>}, {pipeline_mode = #tpu.pipeline_mode<synchronous>, transform_indices = @transform_3, window_bounds = array<i64: 1, 2>}, {pipeline_mode = #tpu.pipeline_mode<synchronous>, transform_indices = @transform_4, window_bounds = array<i64: 1, 2>}, {transform_indices = @transform_5, window_bounds = array<i64: 16, 2>}]} {
    %c0 = arith.constant 0 : index
    %c0_0 = arith.constant 0 : index
    %c0_1 = arith.constant 0 : index
    %0 = vector.load %arg1[%c0, %c0_0, %c0_1] : memref<16x8x128xf32, #tpu.memory_space<vmem>>, vector<16x8x128xf32>
    %c0_2 = arith.constant 0 : index
    %c0_3 = arith.constant 0 : index
    %1 = vector.load %arg2[%c0_2, %c0_3] : memref<2x128xf32, #tpu.memory_space<vmem>>, vector<1x128xf32>
    %2 = vector.shape_cast %1 : vector<1x128xf32> to vector<128xf32>
    %3 = vector.shape_cast %2 : vector<128xf32> to vector<1x1x128xf32>
    %c1 = arith.constant 1 : index
    %c0_4 = arith.constant 0 : index
    %4 = vector.load %arg2[%c1, %c0_4] : memref<2x128xf32, #tpu.memory_space<vmem>>, vector<1x128xf32>
    %5 = vector.shape_cast %4 : vector<1x128xf32> to vector<128xf32>
    %6 = vector.shape_cast %5 : vector<128xf32> to vector<1x1x128xf32>
    %c0_5 = arith.constant 0 : index
    %c0_6 = arith.constant 0 : index
    %7 = memref.load %arg3[%c0_5, %c0_6] : memref<1x2xf32, #tpu.memory_space<smem>>
    %8 = vector.extract_strided_slice %0 {offsets = [0, 0, 0], sizes = [16, 7, 128], strides = [1, 1, 1]} : vector<16x8x128xf32> to vector<16x7x128xf32>
    %9 = vector.broadcast %3 : vector<1x1x128xf32> to vector<16x7x128xf32>
    %10 = arith.mulf %8, %9 : vector<16x7x128xf32>
    %11 = vector.extract_strided_slice %0 {offsets = [0, 1, 0], sizes = [16, 7, 128], strides = [1, 1, 1]} : vector<16x8x128xf32> to vector<16x7x128xf32>
    %12 = vector.broadcast %6 : vector<1x1x128xf32> to vector<16x7x128xf32>
    %13 = arith.mulf %11, %12 : vector<16x7x128xf32>
    %14 = arith.addf %10, %13 : vector<16x7x128xf32>
    %cst = arith.constant dense<0.000000e+00> : vector<16x7xf32>
    %15 = vector.multi_reduction <add>, %14, %cst [2] : vector<16x7x128xf32> to vector<16x7xf32>
    %16 = vector.broadcast %7 : f32 to vector<16x7xf32>
    %17 = arith.addf %15, %16 : vector<16x7xf32>
    %cst_7 = arith.constant 0.000000e+00 : f32
    %18 = vector.broadcast %cst_7 : f32 to vector<16x7xf32>
    %19 = arith.maximumf %17, %18 : vector<16x7xf32>
    %20 = vector.broadcast %cst_7 : f32 to vector<16x7xf32>
    %21 = arith.subf %17, %20 : vector<16x7xf32>
    %22 = arith.cmpf one, %21, %21 : vector<16x7xf32>
    %23 = vector.broadcast %cst_7 : f32 to vector<16x7xf32>
    %24 = arith.addf %17, %23 : vector<16x7xf32>
    %25 = math.absf %21 : vector<16x7xf32>
    %cst_8 = arith.constant 0.000000e+00 : f32
    %26 = vector.broadcast %cst_8 : f32 to vector<16x7xf32>
    %27 = arith.subf %26, %25 : vector<16x7xf32>
    %28 = math.exp %27 : vector<16x7xf32>
    %29 = math.log1p %28 : vector<16x7xf32>
    %30 = arith.addf %19, %29 : vector<16x7xf32>
    %31 = arith.select %22, %24, %30 : vector<16x7xi1>, vector<16x7xf32>
    %32 = math.tanh %31 : vector<16x7xf32>
    %33 = arith.mulf %17, %32 : vector<16x7xf32>
    %cst_9 = arith.constant dense<0xFF800000> : vector<16xf32>
    %34 = vector.multi_reduction <maximumf>, %33, %cst_9 [1] : vector<16x7xf32> to vector<16xf32>
    %35 = vector.shape_cast %34 : vector<16xf32> to vector<16x1xf32>
    %36 = vector.extract_strided_slice %0 {offsets = [0, 0, 0], sizes = [16, 1, 128], strides = [1, 1, 1]} : vector<16x8x128xf32> to vector<16x1x128xf32>
    %37 = vector.broadcast %6 : vector<1x1x128xf32> to vector<16x1x128xf32>
    %38 = arith.mulf %36, %37 : vector<16x1x128xf32>
    %cst_10 = arith.constant dense<0.000000e+00> : vector<16x1xf32>
    %39 = vector.multi_reduction <add>, %38, %cst_10 [2] : vector<16x1x128xf32> to vector<16x1xf32>
    %40 = vector.extract_strided_slice %0 {offsets = [0, 7, 0], sizes = [16, 1, 128], strides = [1, 1, 1]} : vector<16x8x128xf32> to vector<16x1x128xf32>
    %41 = vector.broadcast %3 : vector<1x1x128xf32> to vector<16x1x128xf32>
    %42 = arith.mulf %40, %41 : vector<16x1x128xf32>
    %cst_11 = arith.constant dense<0.000000e+00> : vector<16x1xf32>
    %43 = vector.multi_reduction <add>, %42, %cst_11 [2] : vector<16x1x128xf32> to vector<16x1xf32>
    %44 = vector.broadcast %7 : f32 to vector<16x1xf32>
    %45 = arith.addf %39, %44 : vector<16x1xf32>
    %cst_12 = arith.constant 0.000000e+00 : f32
    %46 = vector.broadcast %cst_12 : f32 to vector<16x1xf32>
    %47 = arith.maximumf %45, %46 : vector<16x1xf32>
    %48 = vector.broadcast %cst_12 : f32 to vector<16x1xf32>
    %49 = arith.subf %45, %48 : vector<16x1xf32>
    %50 = arith.cmpf one, %49, %49 : vector<16x1xf32>
    %51 = vector.broadcast %cst_12 : f32 to vector<16x1xf32>
    %52 = arith.addf %45, %51 : vector<16x1xf32>
    %53 = math.absf %49 : vector<16x1xf32>
    %cst_13 = arith.constant 0.000000e+00 : f32
    %54 = vector.broadcast %cst_13 : f32 to vector<16x1xf32>
    %55 = arith.subf %54, %53 : vector<16x1xf32>
    %56 = math.exp %55 : vector<16x1xf32>
    %57 = math.log1p %56 : vector<16x1xf32>
    %58 = arith.addf %47, %57 : vector<16x1xf32>
    %59 = arith.select %50, %52, %58 : vector<16x1xi1>, vector<16x1xf32>
    %60 = math.tanh %59 : vector<16x1xf32>
    %61 = arith.mulf %45, %60 : vector<16x1xf32>
    %62 = arith.maximumf %35, %61 : vector<16x1xf32>
    %63 = vector.broadcast %7 : f32 to vector<16x1xf32>
    %64 = arith.addf %43, %63 : vector<16x1xf32>
    %cst_14 = arith.constant 0.000000e+00 : f32
    %65 = vector.broadcast %cst_14 : f32 to vector<16x1xf32>
    %66 = arith.maximumf %64, %65 : vector<16x1xf32>
    %67 = vector.broadcast %cst_14 : f32 to vector<16x1xf32>
    %68 = arith.subf %64, %67 : vector<16x1xf32>
    %69 = arith.cmpf one, %68, %68 : vector<16x1xf32>
    %70 = vector.broadcast %cst_14 : f32 to vector<16x1xf32>
    %71 = arith.addf %64, %70 : vector<16x1xf32>
    %72 = math.absf %68 : vector<16x1xf32>
    %cst_15 = arith.constant 0.000000e+00 : f32
    %73 = vector.broadcast %cst_15 : f32 to vector<16x1xf32>
    %74 = arith.subf %73, %72 : vector<16x1xf32>
    %75 = math.exp %74 : vector<16x1xf32>
    %76 = math.log1p %75 : vector<16x1xf32>
    %77 = arith.addf %66, %76 : vector<16x1xf32>
    %78 = arith.select %69, %71, %77 : vector<16x1xi1>, vector<16x1xf32>
    %79 = math.tanh %78 : vector<16x1xf32>
    %80 = arith.mulf %64, %79 : vector<16x1xf32>
    %81 = arith.maximumf %62, %80 : vector<16x1xf32>
    %c0_16 = arith.constant 0 : index
    %c1_17 = arith.constant 1 : index
    %82 = memref.load %arg3[%c0_16, %c1_17] : memref<1x2xf32, #tpu.memory_space<smem>>
    %83 = vector.broadcast %82 : f32 to vector<16x1xf32>
    %84 = arith.maximumf %81, %83 : vector<16x1xf32>
    %c0_18 = arith.constant 0 : index
    %c0_19 = arith.constant 0 : index
    %85 = vector.load %arg4[%c0_18, %c0_19] : memref<1x2xf32, #tpu.memory_space<vmem>>, vector<1x2xf32>
    %86 = vector.broadcast %84 : vector<16x1xf32> to vector<16x2xf32>
    %87 = vector.broadcast %85 : vector<1x2xf32> to vector<16x2xf32>
    %88 = arith.mulf %86, %87 : vector<16x2xf32>
    %c0_20 = arith.constant 0 : index
    %c0_21 = arith.constant 0 : index
    %89 = vector.load %arg5[%c0_20, %c0_21] : memref<1x2xf32, #tpu.memory_space<vmem>>, vector<1x2xf32>
    %90 = vector.broadcast %89 : vector<1x2xf32> to vector<16x2xf32>
    %91 = arith.addf %88, %90 : vector<16x2xf32>
    %c0_22 = arith.constant 0 : index
    %c0_23 = arith.constant 0 : index
    %92 = vector.load %arg6[%c0_22, %c0_23] : memref<16x2xf32, #tpu.memory_space<vmem>>, vector<16x2xf32>
    tpu.vector_store %arg6[%c0_22, %c0_23], %91 {strides = array<i32>} : memref<16x2xf32, #tpu.memory_space<vmem>>, vector<16x2xf32>,
    return
  }
  func.func @transform_0(%arg0: i32) -> (i32, i32, i32) {
    %c0_i32 = arith.constant 0 : i32
    %c0_i32_0 = arith.constant 0 : i32
    %c0_i32_1 = arith.constant 0 : i32
    return %arg0, %c0_i32, %c0_i32_0 : i32, i32, i32
  }
  func.func @transform_1(%arg0: i32) -> (i32, i32) {
    %c0_i32 = arith.constant 0 : i32
    %c0_i32_0 = arith.constant 0 : i32
    %c0_i32_1 = arith.constant 0 : i32
    return %c0_i32, %c0_i32_0 : i32, i32
  }
  func.func @transform_2(%arg0: i32) -> (i32, i32) {
    %c0_i32 = arith.constant 0 : i32
    %c0_i32_0 = arith.constant 0 : i32
    %c0_i32_1 = arith.constant 0 : i32
    return %c0_i32, %c0_i32_0 : i32, i32
  }
  func.func @transform_3(%arg0: i32) -> (i32, i32) {
    %c0_i32 = arith.constant 0 : i32
    %c0_i32_0 = arith.constant 0 : i32
    %c0_i32_1 = arith.constant 0 : i32
    return %c0_i32, %c0_i32_0 : i32, i32
  }
  func.func @transform_4(%arg0: i32) -> (i32, i32) {
    %c0_i32 = arith.constant 0 : i32
    %c0_i32_0 = arith.constant 0 : i32
    %c0_i32_1 = arith.constant 0 : i32
    return %c0_i32, %c0_i32_0 : i32, i32
  }
  func.func @transform_5(%arg0: i32) -> (i32, i32) {
    %c0_i32 = arith.constant 0 : i32
    %c0_i32_0 = arith.constant 0 : i32
    return %arg0, %c0_i32 : i32, i32
  }
}

</mosaic_0001>

<bundles_post_ra>
// kernel: tpu_custom_call.1
= control target key start
LH: loop header
LB: loop body
LE: loop exit
PB: predicated region body
PF: predicated region fallthrough
CT: control target
= control target key end

     0   :  { %10 = vsyncpa [#allocation3], 0  ;;  %s4245_s0 = inlined_call_operand.hbm [shape: f32[64,8,128], index: 0, kind: input, shape index: {}]   ;;  %s4246_s1 = inlined_call_operand.hbm [shape: f32[2,128], index: 1, kind: input, shape index: {}]   ;;  %s4247_s2 = inlined_call_operand.vmem [shape: f32[1,2], index: 2, kind: input, shape index: {}]   ;;  %s4248_s3 = inlined_call_operand.vmem [shape: f32[1,2], index: 3, kind: input, shape index: {}]   ;;  %s4249_s4 = inlined_call_operand.vmem [shape: f32[1,2], index: 4, kind: input, shape index: {}]   ;;  %s4250_s5 = inlined_call_operand.vmem [shape: f32[64,2], index: 5, kind: output, shape index: {}]  }
   0x1   :  { %12 = vsyncpa [#allocation3 + $0x1], 0 }
   0x2   :  { %13 = vsyncpa [#allocation6], 0 }
   0x3   :  { %14 = vsyncpa [#allocation4], 0  ;;  %s2442_s18 = smov 0   ;;  %s2444_s19 = smov 0  }
   0x4   :  { %s2446_s20 = smov 0   ;;  %s2448_s21 = smov 0  }
   0x5 LB: > { %s1919_s22 = sadd.s32 4294967295, %s2404_s21   ;;  %s2462_s23 = sadd.s32 1, %s2404_s21   ;;  %s2404_s21 = sphi %s2448_s21, %s4451_s21   ;;  %s2400_s20 = sphi %s2446_s20, %s4450_s20   ;;  %s2396_s19 = sphi %s2444_s19, %s4449_s19   ;;  %s2392_s18 = sphi %s2442_s18, %s4448_s18  }
   0x6   : > { %s24_s24 = ssub.s32 %s2404_s21, %s2462_s23  ;;  %s27_s25 = sadd.s32 1, %s2400_s20 }
   0x7   : > { %p25_p0 = scmp.eq.s32.totalorder %s24_s24, 0  ;;  %p34_p1 = scmp.ne.s32.totalorder %s2400_s20, %s2396_s19 }
   0x8   : > { %p35_p2 = scmp.eq.s32.totalorder %s2404_s21, 0  ;;  %p40_p3 = scmp.ne.s32.totalorder %s2396_s19, %s2392_s18 }
   0x9   : > { %s2472_s26 = scalar_select %p25_p0, %s2400_s20, %s27_s25  }
   0xa   : > { %p2474_p4 = por %p35_p2, %p34_p1  ;;  %p2480_p5 = scmp.eq.s32.totalorder %s1919_s22, 0 }
   0xb   : > { %p1921_p6 = scmp.ge.s32.totalorder %s2404_s21, 1  ;;  %p161_p7 = scmp.lt.s32.totalorder %s2404_s21, 5 }
   0xc   : > { %s4271_s28 = scalar_select %p2480_p5, 1, 0 }
   0xd   : > { %p2488_p8 = por %p2480_p5, %p40_p3  ;;  %p2492_p9 = pnand %p1921_p6, %p161_p7 }
   0xe   : > { %s2406_s6 = smov [#allocation5]   ;;  %p1963_p11 = scmp.lt.s32.totalorder %s2404_s21, 4 }
   0xf   : > { %s4272_s29 = scalar_select %p2488_p8, 1, 0 }
  0x10   : > { %s4273_s30 = scalar_select %p2492_p9, 1, 0 }
  0x11   : > { %s174_s7 = sshll.u32 %s2406_s6, 4  ;;  %p1950_p10 = pneg %p2492_p9  ;;  %s175_s7 = int_to_ptr.vmem [resolvable:$true] %s174_s7 }
  0x12   : > { %s185_s10 = sshll.u32 %s4247_s2, 4  ;;  %p2510_p13 = pnand %p1963_p11, %p2474_p4  ;;  %s186_s10 = int_to_ptr.vmem [resolvable:$true] %s185_s10 }
  0x13   : > { %p2504_p12 = pnand %p1950_p10, %p2480_p5  ;;  %s202_s13 = sand.u32 1, %s2400_s20  }
  0x14   : > { %s4275_s12 = scalar_select %p2510_p13, 1, 0 }
  0x15   : > { %p2295_p0 = pneg %p2504_p12  ;;  %s2304_s14 = scalar_lea.vmem %s175_s7, 32 }
  0x16   : > { %p2305_p1 = scmp.ne.s32.totalorder %s175_s7, %s2304_s14  ;;  %p2312_p6 = scmp.lt.s32.totalorder %s175_s7, %s175_s7 }
  0x17   : > { %p2313_p7 = scmp.lt.s32.totalorder %s2304_s14, %s2304_s14 }
  0x18   : > { %p2307_p2 = pnand %p2305_p1, %p2295_p0 }
  0x19   : > { %p2314_p10 = por %p2313_p7, %p2312_p6 }
  0x1a   : > { %p2308_p3 = pneg %p2307_p2 }
  0x1c   : > { %p2315_p5 = pnand %p2314_p10, %p2308_p3 }
  0x1e   : > { %2318 = shalt.err (!%p2315_p5)
}
  0x1f   : > { %1953 = dma.hbm_to_vmem [thread:$0]  (!%p2504_p12), %s4246_s1, 32, %s175_s7, [#allocation6]  }
  0x20   : > { %s2319_s17 = scalar_lea.vmem %s186_s10, 16  ;;  %p2327_p1 = scmp.lt.s32.totalorder %s186_s10, %s186_s10 }
  0x21   : > { %p2320_p4 = scmp.ne.s32.totalorder %s186_s10, %s2319_s17  ;;  %p2328_p2 = scmp.lt.s32.totalorder %s2319_s17, %s2319_s17 }
  0x23   : > { %p2322_p11 = pnand %p2320_p4, %p2295_p0  ;;  %p2329_p9 = por %p2328_p2, %p2327_p1 }
  0x25   : > { %p2323_p8 = pneg %p2322_p11 }
  0x27   : > { %p2330_p13 = pnand %p2329_p9, %p2323_p8 }
  0x29   : > { %2333 = shalt.err (!%p2330_p13)
}
  0x2a   : > { %s2407_s18 = smov [#allocation7]   ;;  %s1925_s24 = sshll.u32 %s202_s13, 7 }
  0x2b   : > { %1956 = dma.vmem_to_smem (!%p2504_p12), %s186_s10, 16, %s2407_s18, [#allocation4]  }
  0x2c   : > { %s1939_s25 = sshll.u32 %s2404_s21, 11  ;;  %s206_s8 = scalar_lea.vmem [#allocation2], %s1925_s24 }
  0x2d   : > { %s2534_s7 = scalar_lea.hbm %s4245_s0, %s1939_s25  ;;  %s213_s9 = sshll.u32 %s206_s8, 4  ;;  %s2536_s9 = int_to_ptr.vmem [resolvable:$true] %s213_s9 }
  0x2e   : > { %s2538_s14 = scalar_lea.sflag [#allocation3], %s202_s13  ;;  %s2334_s11 = scalar_lea.hbm %s2534_s7, 2048 }
  0x2f   : > { %p2335_p5 = scmp.ne.s32.totalorder %s2534_s7, %s2334_s11  ;;  %p4276_p8 = scmp.ne.s32.totalorder %s4275_s12, 0 }
  0x30   : > { %s2339_s16 = scalar_lea.hbm %s4245_s0, 8192  ;;  %p2340_p0 = scmp.lt.s32.totalorder %s2534_s7, %s4245_s0 }
  0x31   : > { %p2336_p9 = pneg %p4276_p8  ;;  %p2341_p3 = scmp.lt.s32.totalorder %s2339_s16, %s2334_s11 }
  0x33   : > { %p2337_p12 = pnand %p2336_p9, %p2335_p5  ;;  %p2342_p6 = por %p2341_p3, %p2340_p0 }
  0x35   : > { %p2338_p13 = pneg %p2337_p12 }
  0x37   : > { %p2343_p7 = pnand %p2342_p6, %p2338_p13 }
  0x39   : > { %2346 = shalt.err (!%p2343_p7)
}
  0x3a   : > { %s2347_s13 = scalar_lea.vmem %s2536_s9, 2048  ;;  %s2408_s24 = smov [#allocation2]  }
  0x3b   : > { %p2348_p10 = scmp.ne.s32.totalorder %s2536_s9, %s2347_s13  ;;  %s2352_s25 = sshll.u32 %s2408_s24, 4  ;;  %s2353_s25 = int_to_ptr.vmem [resolvable:$false] %s2352_s25 }
  0x3c   : > { %s2354_s27 = scalar_lea.vmem %s2353_s25, 4096  ;;  %p2355_p1 = scmp.lt.s32.totalorder %s2536_s9, %s2353_s25 }
  0x3d   : > { %p2350_p4 = pnand %p2348_p10, %p2336_p9  ;;  %p2356_p2 = scmp.lt.s32.totalorder %s2354_s27, %s2347_s13 }
  0x3f   : > { %p2351_p11 = pneg %p2350_p4  ;;  %p2357_p5 = por %p2356_p2, %p2355_p1 }
  0x41   : > { %p2358_p12 = pnand %p2357_p5, %p2351_p11 }
  0x43   : > { %2361 = shalt.err (!%p2358_p12)
}
  0x44   : > { %s2409_s6 = smov 128   ;;  %s2410_s8 = smov 8  }
  0x45   : > { %1960 = dma.hbm_to_vmem [thread:$0]  (!%p4276_p8), %s2534_s7, 2048, %s2536_s9, %s2538_s14, %s2409_s6, %s2409_s6, %s2410_s8  }
  0x46   : > { %p4277_p9 = scmp.ne.s32.totalorder %s4273_s30, 0 }
  0x48   : > { %225 = sbr.rel (%p4277_p9) target bundleno = 752 (0x2f0), region = 40 }
  0x4d   : > { %s227_s11 = sand.u32 1, %s2396_s19   ;;  %p4278_p13 = scmp.ne.s32.totalorder %s4272_s29, 0 }
  0x4e   : > { %s1929_s10 = sshll.u32 %s227_s11, 7  ;;  %s228_s15 = scalar_lea.sflag [#allocation3], %s227_s11 }
  0x4f   : > { %s2562_s16 = scalar_lea.vmem [#allocation2], %s1929_s10 }
  0x50   : > { %2379 = dma.done.wait (%p4278_p13), %s228_s15, 2048  }
  0x51   : > { %2381 = vsyncadd (%p4278_p13), %s228_s15, 4294965248  ;;  %p4279_p0 = scmp.ne.s32.totalorder %s4271_s28, 0 }
  0x53   : > { %2383 = dma.done.wait (%p4279_p0), [#allocation6], 32  }
  0x54   : > { %2385 = vsyncadd (%p4279_p0), [#allocation6], 4294967264 }
  0x55   : > { %2387 = dma.done.wait (%p4279_p0), [#allocation4], 16  }
  0x56   : > { %2389 = vsyncadd (%p4279_p0), [#allocation4], 4294967280 }
  0x57   : > { %244 = sfence }
  0x58   : > { %v293_v0 = vlaneseq  ;;  %v2579_v2 = vld [vmem:[#allocation5] sm:$0x1]  ;;  %v2581_v3 = vld [vmem:[#allocation5 + $0x1] sm:$0x1]  ;;  %v2585_v5 = vld [vmem:[%s2562_s16 + $0x10] sm:$0xff]  ;;  %vm397_vm0 = vcmask 1046528  }
  0x59   : > { %v2588_v6 = vld [vmem:[%s2562_s16] sm:$0xff]  ;;  %v2600_v10 = vld [vmem:[%s2562_s16 + $0x8] sm:$0xff]  ;;  %v2603_v11 = vld [vmem:[%s2562_s16 + $0x18] sm:$0xff]  ;;  %vm911_vm1 = vcmask 1040384   ;;  %vm877_vm2 = vcmask 1047559   ;;  %s292_s28 = sld [smem:[#allocation7]] }
  0x5a   : > { %v2577_v1 = vshrl.u32 %v293_v0, 7  ;;  %v2597_v9 = vld [vmem:[%s2562_s16 + $0x40] sm:$0xff]  ;;  %v2614_v16 = vld [vmem:[%s2562_s16 + $0x48] sm:$0xff]  ;;  %v2638_v37 = vld [vmem:[%s2562_s16 + $0x50] sm:$0xff]  ;;  %s1934_s29 = sld [smem:[#allocation7 + $0x1]]  ;;  %s1932_s30 = sshll.u32 %s1919_s22, 1 }
  0x5b   : > { %v2627_v24 = vld [vmem:[%s2562_s16 + $0x20] sm:$0xff]  ;;  %v2641_v38 = vld [vmem:[%s2562_s16 + $0x28] sm:$0xff]  ;;  %v2648_v42 = vld [vmem:[%s2562_s16 + $0x58] sm:$0xff]  ;;  %p269_p8 = scmp.lt.s32.totalorder %s1932_s30, 7 }
  0x5c   : > { %v295_v4 = vsub.s32 0, %v2577_v1  ;;  %v2659_v51 = vld [vmem:[%s2562_s16 + $0x30] sm:$0xff]  ;;  %v2662_v52 = vld [vmem:[%s2562_s16 + $0x60] sm:$0xff] }
  0x5d   : > { %s4453_s30 = smov (!%p269_p8, %s1932_s30), 7 }
  0x5e   : > { %v2591_v7 = vrot.slane %v2579_v2, %v295_v4  ;;  %v2594_v8 = vrot.slane %v2581_v3, %v295_v4  ;;  %s1933_s9 = sshll.u32 %s4453_s30, 3 }
  0x5f   : > { %s272_s24 = scalar_lea.vmem %s4250_s5, %s1933_s9 }
  0x60   : > { %v299_v12 = vmul.f32 %v2591_v7, %v2585_v5  ;;  %v319_v13 = vmul.f32 %v2594_v8, %v2585_v5  ;;  %v297_v14 = vmul.f32 %v2591_v7, %v2588_v6  ;;  %v317_v15 = vmul.f32 %v2594_v8, %v2588_v6 }
  0x61   : > { %v305_v17 = vmul.f32 %v2591_v7, %v2597_v9  ;;  %v325_v18 = vmul.f32 %v2594_v8, %v2597_v9  ;;  %v298_v19 = vmul.f32 %v2591_v7, %v2600_v10  ;;  %v318_v20 = vmul.f32 %v2594_v8, %v2600_v10 }
  0x62   : > { %v351_v21 = vrot.slane %v319_v13, 1  ;;  %v349_v22 = vrot.slane %v317_v15, 1  ;;  %v320_v23 = vmul.f32 %v2594_v8, %v2603_v11  ;;  %v300_v27 = vmul.f32 %v2591_v7, %v2603_v11  ;;  %v2680_v13 = vld [vmem:[%s2562_s16 + $0x68] sm:$0xff] }
  0x63   : > { %v357_v25 = vrot.slane %v325_v18, 1  ;;  %v350_v26 = vrot.slane %v318_v20, 1  ;;  %v326_v28 = vmul.f32 %v2594_v8, %v2614_v16  ;;  %v306_v32 = vmul.f32 %v2591_v7, %v2614_v16 }
  0x64   : > { %v383_v29 = vadd.f32 %v351_v21, %v299_v12  ;;  %v381_v30 = vadd.f32 %v349_v22, %v297_v14  ;;  %v352_v31 = vrot.slane %v320_v23, 1  ;;  %v321_v36 = vmul.f32 %v2594_v8, %v2627_v24  ;;  %v2677_v12 = vld [vmem:[%s2562_s16 + $0x38] sm:$0xff] }
  0x65   : > { %v389_v33 = vadd.f32 %v357_v25, %v305_v17  ;;  %v382_v34 = vadd.f32 %v350_v26, %v298_v19  ;;  %v358_v35 = vrot.slane %v326_v28, 1  ;;  %v301_v41 = vmul.f32 %v2591_v7, %v2627_v24  ;;  %v2693_v26 = vld [vmem:[%s2562_s16 + $0x78] sm:$0xff] }
  0x66   : > { %v404_v39 = vsel %vm397_vm0, %v383_v29, 0.0  ;;  %v398_v40 = vsel %vm397_vm0, %v381_v30, 0.0  ;;  %v384_v45 = vadd.f32 %v352_v31, %v300_v27  ;;  %v307_v46 = vmul.f32 %v2591_v7, %v2638_v37  ;;  %v2696_v27 = vld [vmem:[%s2562_s16 + $0x70] sm:$0xff] }
  0x67   : > { %405 = vadd.xlane.f32.xlu1 %v404_v39  ;;  %399 = vadd.xlane.f32.xlu0 %v398_v40  ;;  %v422_v43 = vsel %vm397_vm0, %v389_v33, 0.0  ;;  %v401_v44 = vsel %vm397_vm0, %v382_v34, 0.0  ;;  %v390_v47 = vadd.f32 %v358_v35, %v306_v32  ;;  %v353_v48 = vrot.slane %v321_v36, 1 }
  0x68   : > { %v327_v49 = vmul.f32 %v2594_v8, %v2638_v37  ;;  %v322_v50 = vmul.f32 %v2594_v8, %v2641_v38  ;;  %v328_v53 = vmul.f32 %v2594_v8, %v2648_v42  ;;  %v302_v55 = vmul.f32 %v2591_v7, %v2641_v38 }
  0x69   : > { %v308_v56 = vmul.f32 %v2591_v7, %v2648_v42  ;;  %v323_v59 = vmul.f32 %v2594_v8, %v2659_v51  ;;  %v329_v60 = vmul.f32 %v2594_v8, %v2662_v52  ;;  %v407_v61 = vsel %vm397_vm0, %v384_v45, 0.0 }
  0x6a   : > { %v359_v54 = vrot.slane %v327_v49, 1  ;;  %v354_v57 = vrot.slane %v322_v50, 1  ;;  %v360_v58 = vrot.slane %v328_v53, 1  ;;  %v425_v62 = vsel %vm397_vm0, %v390_v47, 0.0 }
  0x6b   : > { %423 = vadd.xlane.f32.xlu1 %v422_v43  ;;  %402 = vadd.xlane.f32.xlu0 %v401_v44  ;;  %v385_v63 = vadd.f32 %v353_v48, %v301_v41  ;;  %v303_v14 = vmul.f32 %v2591_v7, %v2659_v51  ;;  %v309_v15 = vmul.f32 %v2591_v7, %v2662_v52  ;;  %v355_v19 = vrot.slane %v323_v59, 1 }
  0x6c   : > { %v391_v4 = vadd.f32 %v359_v54, %v307_v46  ;;  %v386_v17 = vadd.f32 %v354_v57, %v302_v55  ;;  %v392_v18 = vadd.f32 %v360_v58, %v308_v56  ;;  %v361_v20 = vrot.slane %v329_v60, 1 }
  0x6d   : > { %v410_v21 = vsel %vm397_vm0, %v385_v63, 0.0  ;;  %v324_v23 = vmul.f32 %v2594_v8, %v2677_v12  ;;  %v330_v25 = vmul.f32 %v2594_v8, %v2680_v13  ;;  %v304_v28 = vmul.f32 %v2591_v7, %v2677_v12 }
  0x6e   : > { %v428_v22 = vsel %vm397_vm0, %v391_v4, 0.0  ;;  %v310_v29 = vmul.f32 %v2591_v7, %v2680_v13  ;;  %v413_v30 = vsel %vm397_vm0, %v386_v17, 0.0  ;;  %v431_v31 = vsel %vm397_vm0, %v392_v18, 0.0 }
  0x6f   : > { %408 = vadd.xlane.f32.xlu1 %v407_v61  ;;  %426 = vadd.xlane.f32.xlu0 %v425_v62  ;;  %v387_v32 = vadd.f32 %v355_v19, %v303_v14  ;;  %v393_v33 = vadd.f32 %v361_v20, %v309_v15  ;;  %v356_v34 = vrot.slane %v324_v23, 1  ;;  %v362_v35 = vrot.slane %v330_v25, 1 }
  0x70   : > { %v332_v36 = vmul.f32 %v2594_v8, %v2693_v26  ;;  %v331_v39 = vmul.f32 %v2594_v8, %v2696_v27  ;;  %v312_v43 = vmul.f32 %v2591_v7, %v2693_v26  ;;  %v311_v44 = vmul.f32 %v2591_v7, %v2696_v27 }
  0x71   : > { %v416_v40 = vsel %vm397_vm0, %v387_v32, 0.0  ;;  %v434_v41 = vsel %vm397_vm0, %v393_v33, 0.0  ;;  %v388_v45 = vadd.f32 %v356_v34, %v304_v28  ;;  %v394_v46 = vadd.f32 %v362_v35, %v310_v29 }
  0x72   : > { %v364_v47 = vrot.slane %v332_v36, 1  ;;  %v363_v48 = vrot.slane %v331_v39, 1  ;;  %v800_v54 = vand.u32 127, %v293_v0  ;;  %v897_v55 = vmul.f32 %v2581_v3, %v2585_v5 }
  0x73   : > { %411 = vadd.xlane.f32.xlu1 %v410_v21  ;;  %429 = vadd.xlane.f32.xlu0 %v428_v22  ;;  %v419_v8 = vsel %vm397_vm0, %v388_v45, 0.0  ;;  %v437_v49 = vsel %vm397_vm0, %v394_v46, 0.0  ;;  %v896_v57 = vmul.f32 %v2581_v3, %v2600_v10  ;;  %v895_v60 = vmul.f32 %v2581_v3, %v2588_v6 }
  0x74   : > { %v396_v50 = vadd.f32 %v364_v47, %v312_v43  ;;  %v395_v53 = vadd.f32 %v363_v48, %v311_v44  ;;  %v2724_v58 = vsub.s32 %v800_v54, %v2577_v1  ;;  %v918_v0 = vsel %vm911_vm1, %v897_v55, 0.0 }
  0x75   : > { %v915_v59 = vsel %vm911_vm1, %v896_v57, 0.0  ;;  %v904_v61 = vmul.f32 %v2581_v3, %v2614_v16  ;;  %v2733_v62 = vrot.slane %v2579_v2, 1  ;;  %v912_v1 = vsel %vm911_vm1, %v895_v60, 0.0 }
  0x76   : > { %v443_v7 = vsel %vm397_vm0, %v396_v50, 0.0  ;;  %v440_v56 = vsel %vm397_vm0, %v395_v53, 0.0  ;;  %v905_v4 = vmul.f32 %v2581_v3, %v2638_v37  ;;  %v898_v14 = vmul.f32 %v2581_v3, %v2603_v11 }
  0x77   : > { %414 = vadd.xlane.f32.xlu1 %v413_v30  ;;  %432 = vadd.xlane.f32.xlu0 %v431_v31  ;;  %v939_v63 = vsel %vm911_vm1, %v904_v61, 0.0  ;;  %v964_v2 = vmul.f32 %v2733_v62, %v2600_v10  ;;  %v963_v18 = vmul.f32 %v2733_v62, %v2588_v6  ;;  %v903_v21 = vmul.f32 %v2581_v3, %v2597_v9 }
  0x78   : > { %v942_v15 = vsel %vm911_vm1, %v905_v4, 0.0  ;;  %v921_v17 = vsel %vm911_vm1, %v898_v14, 0.0  ;;  %v899_v22 = vmul.f32 %v2581_v3, %v2627_v24  ;;  %v965_v6 = vmul.f32 %v2733_v62, %v2585_v5 }
  0x79   : > { %v982_v19 = vsel %vm877_vm2, %v964_v2, 0.0  ;;  %v979_v20 = vsel %vm877_vm2, %v963_v18, 0.0  ;;  %v936_v10 = vsel %vm911_vm1, %v903_v21, 0.0  ;;  %v906_v25 = vmul.f32 %v2581_v3, %v2648_v42 }
  0x7a   : > { %v924_v23 = vsel %vm911_vm1, %v899_v22, 0.0  ;;  %v985_v28 = vsel %vm877_vm2, %v965_v6, 0.0  ;;  %v972_v30 = vmul.f32 %v2733_v62, %v2614_v16  ;;  %v971_v31 = vmul.f32 %v2733_v62, %v2597_v9 }
  0x7b   : > { %417 = vadd.xlane.f32.xlu1 %v416_v40  ;;  %435 = vadd.xlane.f32.xlu0 %v434_v41  ;;  %v945_v29 = vsel %vm911_vm1, %v906_v25, 0.0  ;;  %v907_v33 = vmul.f32 %v2581_v3, %v2662_v52  ;;  %v900_v34 = vmul.f32 %v2581_v3, %v2641_v38  ;;  %v973_v9 = vmul.f32 %v2733_v62, %v2638_v37 }
  0x7c   : > { %v1006_v32 = vsel %vm877_vm2, %v972_v30, 0.0  ;;  %v1003_v5 = vsel %vm877_vm2, %v971_v31, 0.0  ;;  %v966_v36 = vmul.f32 %v2733_v62, %v2603_v11  ;;  %v908_v41 = vmul.f32 %v2581_v3, %v2680_v13 }
  0x7d   : > { %v948_v35 = vsel %vm911_vm1, %v907_v33, 0.0  ;;  %v927_v16 = vsel %vm911_vm1, %v900_v34, 0.0  ;;  %v1009_v39 = vsel %vm877_vm2, %v973_v9, 0.0  ;;  %v901_v43 = vmul.f32 %v2581_v3, %v2659_v51 }
  0x7e   : > { %v988_v40 = vsel %vm877_vm2, %v966_v36, 0.0  ;;  %v951_v44 = vsel %vm911_vm1, %v908_v41, 0.0  ;;  %v974_v11 = vmul.f32 %v2733_v62, %v2648_v42  ;;  %v967_v45 = vmul.f32 %v2733_v62, %v2627_v24 }
  0x7f   : > { %420 = vadd.xlane.f32.xlu1 %v419_v8  ;;  %438 = vadd.xlane.f32.xlu0 %v437_v49  ;;  %v930_v37 = vsel %vm911_vm1, %v901_v43, 0.0  ;;  %v909_v48 = vmul.f32 %v2581_v3, %v2696_v27  ;;  %v902_v8 = vmul.f32 %v2581_v3, %v2677_v12  ;;  %v975_v24 = vmul.f32 %v2733_v62, %v2662_v52 }
  0x80   : > { %v1012_v46 = vsel %vm877_vm2, %v974_v11, 0.0  ;;  %v991_v47 = vsel %vm877_vm2, %v967_v45, 0.0  ;;  %v968_v50 = vmul.f32 %v2733_v62, %v2641_v38  ;;  %v969_v55 = vmul.f32 %v2733_v62, %v2659_v51 }
  0x81   : > { %v954_v49 = vsel %vm911_vm1, %v909_v48, 0.0  ;;  %v933_v42 = vsel %vm911_vm1, %v902_v8, 0.0  ;;  %v1015_v53 = vsel %vm877_vm2, %v975_v24, 0.0  ;;  %v977_v38 = vmul.f32 %v2733_v62, %v2696_v27 }
  0x82   : > { %v994_v54 = vsel %vm877_vm2, %v968_v50, 0.0  ;;  %v976_v57 = vmul.f32 %v2733_v62, %v2680_v13 }
  0x83   : > { %444 = vadd.xlane.f32.xlu1 %v443_v7  ;;  %441 = vadd.xlane.f32.xlu0 %v440_v56  ;;  %v910_v7 = vmul.f32 %v2581_v3, %v2693_v26  ;;  %v997_v56 = vsel %vm877_vm2, %v969_v55, 0.0  ;;  %v978_v3 = vmul.f32 %v2733_v62, %v2693_v26 }
  0x84   : > { %v1018_v51 = vsel %vm877_vm2, %v976_v57, 0.0 }
  0x85   : > { %v957_v52 = vsel %vm911_vm1, %v910_v7, 0.0  ;;  %v1024_v60 = vsel %vm877_vm2, %v978_v3, 0.0 }
  0x87   : > { %919 = vadd.xlane.f32.xlu1 %v918_v0  ;;  %916 = vadd.xlane.f32.xlu0 %v915_v59  ;;  %v1021_v0 = vsel %vm877_vm2, %v977_v38, 0.0  ;;  %v970_v59 = vmul.f32 %v2733_v62, %v2677_v12 }
  0x89   : > { %v1000_v27 = vsel %vm877_vm2, %v970_v59, 0.0 }
  0x8b   : > { %913 = vadd.xlane.f32.xlu1 %v912_v1  ;;  %940 = vadd.xlane.f32.xlu0 %v939_v63  ;;  %v2821_v1 = vstv %s292_s28 }
  0x8c   : > { %4280 = vst [vmem:[#allocation11_spill] sm:$0xff] %v2821_v1 }
  0x8f   : > { %943 = vadd.xlane.f32.xlu1 %v942_v15  ;;  %922 = vadd.xlane.f32.xlu0 %v921_v17 }
  0x93   : > { %983 = vadd.xlane.f32.xlu1 %v982_v19  ;;  %980 = vadd.xlane.f32.xlu0 %v979_v20 }
  0x97   : > { %937 = vadd.xlane.f32.xlu1 %v936_v10  ;;  %925 = vadd.xlane.f32.xlu0 %v924_v23 }
  0x9b   : > { %986 = vadd.xlane.f32.xlu1 %v985_v28  ;;  %946 = vadd.xlane.f32.xlu0 %v945_v29 }
  0x9f   : > { %1007 = vadd.xlane.f32.xlu1 %v1006_v32  ;;  %1004 = vadd.xlane.f32.xlu0 %v1003_v5 }
  0xa3   : > { %949 = vadd.xlane.f32.xlu1 %v948_v35  ;;  %928 = vadd.xlane.f32.xlu0 %v927_v16 }
  0xa7   : > { %1010 = vadd.xlane.f32.xlu1 %v1009_v39  ;;  %989 = vadd.xlane.f32.xlu0 %v988_v40 }
  0xab   : > { %952 = vadd.xlane.f32.xlu1 %v951_v44  ;;  %931 = vadd.xlane.f32.xlu0 %v930_v37 }
  0xaf   : > { %1013 = vadd.xlane.f32.xlu1 %v1012_v46  ;;  %992 = vadd.xlane.f32.xlu0 %v991_v47 }
  0xb3   : > { %955 = vadd.xlane.f32.xlu1 %v954_v49  ;;  %934 = vadd.xlane.f32.xlu0 %v933_v42 }
  0xb7   : > { %1016 = vadd.xlane.f32.xlu1 %v1015_v53  ;;  %995 = vadd.xlane.f32.xlu0 %v994_v54 }
  0xbb   : > { %998 = vadd.xlane.f32.xlu1 %v997_v56  ;;  %958 = vadd.xlane.f32.xlu0 %v957_v52 }
  0xbf   : > { %1022 = vadd.xlane.f32.xlu1 %v1021_v0  ;;  %1019 = vadd.xlane.f32.xlu0 %v1018_v51 }
  0xc3   : > { %1025 = vadd.xlane.f32.xlu1 %v1024_v60  ;;  %1001 = vadd.xlane.f32.xlu0 %v1000_v27 }
  0xf0   : > { %v406_v13 = vpop.xlane.xlu1 %405  ;;  %v400_v61 = vpop.xlane.xlu0 %399 }
  0xf1   : > { %v2824_v63 = vadd.f32 %v2821_v1, %v406_v13  ;;  %v2827_v4 = vadd.f32 %v2821_v1, %v400_v61 }
  0xf3   : > { %v513_v62 = vand.u32 2147483647, %v2824_v63  ;;  %v511_v17 = vand.u32 2147483647, %v2827_v4  ;;  %v465_v3 = vmax.f32 %v2824_v63, 0.0  ;;  %v463_v13 = vmax.f32 %v2827_v4, 0.0 }
  0xf4   : > { %v424_v26 = vpop.xlane.xlu1 %423  ;;  %v403_v12 = vpop.xlane.xlu0 %402  ;;  %vm481_vm5 = vcmp.ne.f32.partialorder %v2824_v63, %v2824_v63  ;;  %vm479_vm7 = vcmp.ne.f32.partialorder %v2827_v4, %v2827_v4 }
  0xf5   : > { %v2831_v14 = vadd.f32 %v2821_v1, %v424_v26  ;;  %v2835_v2 = vadd.f32 %v2821_v1, %v403_v12  ;;  %v529_v19 = vsub.f32 0.0, %v513_v62  ;;  %v527_v21 = vsub.f32 0.0, %v511_v17 }
  0xf7   : > { %v519_v20 = vand.u32 2147483647, %v2831_v14  ;;  %v512_v6 = vand.u32 2147483647, %v2835_v2  ;;  %v547_v25 = vmul.f32 1.442695, %v529_v19  ;;  %vm487_vm8 = vcmp.ne.f32.partialorder %v2831_v14, %v2831_v14 }
  0xf8   : > { %v409_v15 = vpop.xlane.xlu1 %408  ;;  %v427_v18 = vpop.xlane.xlu0 %426  ;;  %v543_v30 = vmul.f32 1.442695, %v527_v21  ;;  %v471_v61 = vmax.f32 %v2831_v14, 0.0  ;;  %vm480_vm11 = vcmp.ne.f32.partialorder %v2835_v2, %v2835_v2 }
  0xf9   : > { %v2839_v22 = vadd.f32 %v2821_v1, %v409_v15  ;;  %v2842_v23 = vadd.f32 %v2821_v1, %v427_v18  ;;  %v535_v28 = vsub.f32 0.0, %v519_v20  ;;  %v528_v33 = vsub.f32 0.0, %v512_v6 }
  0xfa   : > { %2005 = vpow2.f32 %v547_v25  ;;  %v464_v15 = vmax.f32 %v2835_v2, 0.0 }
  0xfb   : > { %v514_v31 = vand.u32 2147483647, %v2839_v22  ;;  %v520_v32 = vand.u32 2147483647, %v2842_v23  ;;  %v559_v34 = vmul.f32 1.442695, %v535_v28  ;;  %2007 = vpow2.f32 %v543_v30 }
  0xfc   : > { %v412_v10 = vpop.xlane.xlu1 %411  ;;  %v430_v5 = vpop.xlane.xlu0 %429  ;;  %v545_v39 = vmul.f32 1.442695, %v528_v33  ;;  %v466_v17 = vmax.f32 %v2839_v22, 0.0  ;;  %v472_v20 = vmax.f32 %v2842_v23, 0.0  ;;  %vm482_vm13 = vcmp.ne.f32.partialorder %v2839_v22, %v2839_v22 }
  0xfd   : > { %v2846_v29 = vadd.f32 %v2821_v1, %v412_v10  ;;  %v530_v16 = vsub.f32 0.0, %v514_v31  ;;  %v2852_v9 = vadd.f32 %v2821_v1, %v430_v5  ;;  %v536_v36 = vsub.f32 0.0, %v520_v32 }
  0xfe   : > { %2009 = vpow2.f32 %v559_v34  ;;  %vm488_vm14 = vcmp.ne.f32.partialorder %v2842_v23, %v2842_v23 }
  0xff   : > { %v515_v35 = vand.u32 2147483647, %v2846_v29  ;;  %v549_v41 = vmul.f32 1.442695, %v530_v16  ;;  %v521_v43 = vand.u32 2147483647, %v2852_v9  ;;  %2011 = vpow2.f32 %v545_v39 }
 0x100   : > { %v561_v44 = vmul.f32 1.442695, %v536_v36  ;;  %v415_v48 = vpop.xlane.xlu1 %414  ;;  %v433_v50 = vpop.xlane.xlu0 %432  ;;  %v467_v21 = vmax.f32 %v2846_v29, 0.0  ;;  %v473_v32 = vmax.f32 %v2852_v9, 0.0  ;;  %vm483_vm15 = vcmp.ne.f32.partialorder %v2846_v29, %v2846_v29 }
 0x101   : > { %v531_v40 = vsub.f32 0.0, %v515_v35  ;;  %2013 = vpow2.f32 %v549_v41  ;;  %v537_v11 = vsub.f32 0.0, %v521_v43  ;;  %v2864_v24 = vadd.f32 %v2821_v1, %v415_v48 }
 0x102   : > { %2015 = vpow2.f32 %v561_v44  ;;  %v2873_v52 = vadd.f32 %v2821_v1, %v433_v50 }
 0x103   : > { %v551_v37 = vmul.f32 1.442695, %v531_v40  ;;  %v563_v46 = vmul.f32 1.442695, %v537_v11  ;;  %v516_v7 = vand.u32 2147483647, %v2864_v24 }
 0x104   : > { %v418_v55 = vpop.xlane.xlu1 %417  ;;  %v436_v0 = vpop.xlane.xlu0 %435  ;;  %v522_v12 = vand.u32 2147483647, %v2873_v52  ;;  %v468_v35 = vmax.f32 %v2864_v24, 0.0  ;;  %v474_v40 = vmax.f32 %v2873_v52, 0.0 }
 0x105   : > { %2017 = vpow2.f32 %v551_v37  ;;  %v532_v60 = vsub.f32 0.0, %v516_v7  ;;  %v2883_v27 = vadd.f32 %v2821_v1, %v418_v55  ;;  %v2892_v18 = vadd.f32 %v2821_v1, %v436_v0 }
 0x106   : > { %2019 = vpow2.f32 %v563_v46  ;;  %v538_v5 = vsub.f32 0.0, %v522_v12 }
 0x107   : > { %v2855_v45 = vpop.eup %2005  ;;  %v553_v6 = vmul.f32 1.442695, %v532_v60  ;;  %v517_v25 = vand.u32 2147483647, %v2883_v27  ;;  %v523_v16 = vand.u32 2147483647, %v2892_v18 }
 0x108   : > { %v2857_v47 = vpop.eup %2007  ;;  %v593_v8 = vadd.f32 1.0, %v2855_v45  ;;  %v421_v62 = vpop.xlane.xlu1 %420  ;;  %v596_v19 = vmul.f32 -0.5, %v2855_v45  ;;  %v599_v31 = vand.u32 2147483647, %v2855_v45 }
 0x109   : > { %v575_v42 = vadd.f32 1.0, %v2857_v47  ;;  %v2900_v28 = vadd.f32 %v2821_v1, %v421_v62  ;;  %v578_v33 = vmul.f32 -0.5, %v2857_v47  ;;  %v581_v34 = vand.u32 2147483647, %v2857_v47 }
 0x10a   : > { %2021 = vlog2.f32 %v593_v8  ;;  %v597_v36 = vadd.f32 1.0, %v596_v19  ;;  %v533_v44 = vsub.f32 0.0, %v517_v25  ;;  %vm2914_vm3 = vcmp.lt.f32.partialorder %v599_v31, 0.0004427343  ;;  %v439_v19 = vpop.xlane.xlu0 %438 }
 0x10b   : > { %v2860_v49 = vpop.eup %2009  ;;  %2023 = vlog2.f32 %v575_v42  ;;  %v518_v37 = vand.u32 2147483647, %v2900_v28  ;;  %v565_v8 = vmul.f32 1.442695, %v538_v5  ;;  %v579_v42 = vadd.f32 1.0, %v578_v33 }
 0x10c   : > { %v2866_v53 = vpop.eup %2011  ;;  %v647_v54 = vadd.f32 1.0, %v2860_v49  ;;  %v650_v39 = vmul.f32 -0.5, %v2860_v49  ;;  %v653_v48 = vand.u32 2147483647, %v2860_v49  ;;  %vm2919_vm4 = vcmp.lt.f32.partialorder %v581_v34, 0.0004427343 }
 0x10d   : > { %v584_v57 = vadd.f32 1.0, %v2866_v53  ;;  %v539_v55 = vsub.f32 0.0, %v523_v16  ;;  %v555_v12 = vmul.f32 1.442695, %v533_v44  ;;  %v534_v62 = vsub.f32 0.0, %v518_v37  ;;  %v445_v37 = vpop.xlane.xlu1 %444 }
 0x10e   : > { %v2870_v56 = vpop.eup %2013  ;;  %2025 = vlog2.f32 %v647_v54  ;;  %v587_v54 = vmul.f32 -0.5, %v2866_v53  ;;  %v651_v0 = vadd.f32 1.0, %v650_v39  ;;  %vm2928_vm6 = vcmp.lt.f32.partialorder %v653_v48, 0.0004427343 }
 0x10f   : > { %v2875_v38 = vpop.eup %2015  ;;  %v602_v59 = vadd.f32 1.0, %v2870_v56  ;;  %2027 = vlog2.f32 %v584_v57  ;;  %v598_v57 = vmul.f32 %v2855_v45, %v597_v36  ;;  %v580_v25 = vmul.f32 %v2857_v47, %v579_v42 }
 0x110   : > { %v656_v26 = vadd.f32 1.0, %v2875_v38  ;;  %v659_v45 = vmul.f32 -0.5, %v2875_v38  ;;  %v588_v31 = vadd.f32 1.0, %v587_v54  ;;  %v608_v5 = vand.u32 2147483647, %v2870_v56 }
 0x111   : > { %2029 = vlog2.f32 %v602_v59  ;;  %v590_v59 = vand.u32 2147483647, %v2866_v53  ;;  %v567_v33 = vmul.f32 1.442695, %v539_v55  ;;  %v662_v39 = vand.u32 2147483647, %v2875_v38 }
 0x112   : > { %v2878_v51 = vpop.eup %2017  ;;  %2031 = vlog2.f32 %v656_v26  ;;  %v557_v47 = vmul.f32 1.442695, %v534_v62  ;;  %v652_v46 = vmul.f32 %v2860_v49, %v651_v0  ;;  %v660_v42 = vadd.f32 1.0, %v659_v45 }
 0x113   : > { %v611_v10 = vadd.f32 1.0, %v2878_v51  ;;  %v2902_v30 = vpop.eup %2019  ;;  %v614_v44 = vmul.f32 -0.5, %v2878_v51  ;;  %vm2950_vm9 = vcmp.lt.f32.partialorder %v590_v59, 0.0004427343  ;;  %vm2961_vm10 = vcmp.lt.f32.partialorder %v608_v5, 0.0004427343 }
 0x114   : > { %v665_v43 = vadd.f32 1.0, %v2902_v30  ;;  %vm2968_vm12 = vcmp.lt.f32.partialorder %v662_v39, 0.0004427343  ;;  %v671_v39 = vand.u32 2147483647, %v2902_v30 }
 0x115   : > { %2033 = vlog2.f32 %v611_v10  ;;  %v617_v10 = vand.u32 2147483647, %v2878_v51 }
 0x116   : > { %2035 = vpow2.f32 %v553_v6  ;;  %v605_v6 = vmul.f32 -0.5, %v2870_v56  ;;  %vm3042_vm1 = vcmp.lt.f32.partialorder %v671_v39, 0.0004427343 }
 0x117   : > { %v2022_v41 = vpop.eup %2021  ;;  %2037 = vlog2.f32 %v665_v43  ;;  %vm3017_vm0 = vcmp.lt.f32.partialorder %v617_v10, 0.0004427343 }
 0x118   : > { %v2024_v11 = vpop.eup %2023  ;;  %v595_v7 = vmul.f32 0.6931472, %v2022_v41  ;;  %2039 = vpow2.f32 %v565_v8  ;;  %v2942_v41 = vadd.f32 %v2821_v1, %v439_v19  ;;  %v606_v8 = vadd.f32 1.0, %v605_v6 }
 0x119   : > { %v577_v26 = vmul.f32 0.6931472, %v2024_v11  ;;  %2041 = vpow2.f32 %v555_v12  ;;  %v661_v19 = vmul.f32 %v2875_v38, %v660_v42 }
 0x11a   : > { %v601_v16 = vsel %vm2914_vm3, %v598_v57, %v595_v7  ;;  %v589_v7 = vmul.f32 %v2866_v53, %v588_v31  ;;  %2043 = vpow2.f32 %v567_v33  ;;  %v524_v59 = vand.u32 2147483647, %v2942_v41  ;;  %v920_v31 = vpop.xlane.xlu1 %919 }
 0x11b   : > { %v2026_v60 = vpop.eup %2025  ;;  %v583_v43 = vsel %vm2919_vm4, %v580_v25, %v577_v26  ;;  %v721_v50 = vadd.f32 %v601_v16, %v465_v3  ;;  %v615_v26 = vadd.f32 1.0, %v614_v44  ;;  %2045 = vpow2.f32 %v557_v47 }
 0x11c   : > { %v2028_v34 = vpop.eup %2027  ;;  %v649_v36 = vmul.f32 0.6931472, %v2026_v60  ;;  %v719_v57 = vadd.f32 %v583_v43, %v463_v13  ;;  %v607_v12 = vmul.f32 %v2870_v56, %v606_v8  ;;  %v668_v56 = vmul.f32 -0.5, %v2902_v30 }
 0x11d   : > { %v586_v55 = vmul.f32 0.6931472, %v2028_v34  ;;  %v737_v6 = vsel %vm481_vm5, %v2824_v63, %v721_v50  ;;  %v540_v33 = vsub.f32 0.0, %v524_v59  ;;  %v2995_v34 = vadd.f32 %v920_v31, %v2821_v1 }
 0x11e   : > { %v2030_v11 = vpop.eup %2029  ;;  %v655_v49 = vsel %vm2928_vm6, %v652_v46, %v649_v36  ;;  %v735_v38 = vsel %vm479_vm7, %v2827_v4, %v719_v57  ;;  %v616_v36 = vmul.f32 %v2878_v51, %v615_v26  ;;  %2047 = vtanh.f32 %v737_v6 }
 0x11f   : > { %v2032_v54 = vpop.eup %2031  ;;  %v604_v3 = vmul.f32 0.6931472, %v2030_v11  ;;  %v727_v45 = vadd.f32 %v655_v49, %v471_v61  ;;  %v592_v25 = vsel %vm2950_vm9, %v589_v7, %v586_v55  ;;  %v442_v61 = vpop.xlane.xlu0 %441  ;;  %v3009_v46 = vadd.f32 %v2821_v1, %v445_v37 }
 0x120   : > { %v658_v62 = vmul.f32 0.6931472, %v2032_v54  ;;  %v720_v47 = vadd.f32 %v592_v25, %v464_v15  ;;  %2049 = vtanh.f32 %v735_v38  ;;  %v669_v15 = vadd.f32 1.0, %v668_v56 }
 0x121   : > { %v610_v16 = vsel %vm2961_vm10, %v607_v12, %v604_v3  ;;  %4293 = vst [vmem:[#allocation12_spill] sm:$0xff] %v3009_v46  ;;  %v743_v51 = vsel %vm487_vm8, %v2831_v14, %v727_v45  ;;  %v569_v54 = vmul.f32 1.442695, %v540_v33  ;;  %v1093_v50 = vand.u32 2147483647, %v2995_v34 }
 0x122   : > { %v2034_v60 = vpop.eup %2033  ;;  %v664_v11 = vsel %vm2968_vm12, %v661_v19, %v658_v62  ;;  %v722_v42 = vadd.f32 %v610_v16, %v466_v17  ;;  %v469_v7 = vmax.f32 %v2883_v27, 0.0  ;;  %v3030_v57 = vadd.f32 %v2821_v1, %v442_v61  ;;  %v914_v61 = vpop.xlane.xlu1 %913 }
 0x123   : > { %v2972_v13 = vpop.eup %2035  ;;  %v613_v5 = vmul.f32 0.6931472, %v2034_v60  ;;  %v728_v55 = vadd.f32 %v664_v11, %v472_v20  ;;  %v736_v17 = vsel %vm480_vm11, %v2835_v2, %v720_v47  ;;  %v526_v60 = vand.u32 2147483647, %v3009_v46  ;;  %v917_v3 = vpop.xlane.xlu0 %916 }
 0x124   : > { %v620_v43 = vadd.f32 1.0, %v2972_v13  ;;  %v2038_v44 = vpop.eup %2037  ;;  %4296 = vst [vmem:[#allocation13_spill] sm:$0xff] %v3030_v57  ;;  %v3047_v26 = vadd.f32 %v917_v3, %v2821_v1  ;;  %v738_v62 = vsel %vm482_vm13, %v2839_v22, %v722_v42  ;;  %vm489_vm3 = vcmp.ne.f32.partialorder %v2852_v9, %v2852_v9 }
 0x125   : > { %v3011_v48 = vpop.eup %2039  ;;  %v619_v37 = vsel %vm3017_vm0, %v616_v36, %v613_v5  ;;  %v667_v0 = vmul.f32 0.6931472, %v2038_v44  ;;  %v670_v19 = vmul.f32 %v2902_v30, %v669_v15  ;;  %v744_v10 = vsel %vm488_vm14, %v2842_v23, %v728_v55 }
 0x126   : > { %2051 = vlog2.f32 %v620_v43  ;;  %v3032_v49 = vpop.eup %2041  ;;  %v674_v59 = vadd.f32 1.0, %v3011_v48  ;;  %v723_v20 = vadd.f32 %v619_v37, %v467_v21  ;;  %v1109_v21 = vsub.f32 0.0, %v1093_v50 }
 0x127   : > { %2053 = vtanh.f32 %v743_v51  ;;  %v3049_v12 = vpop.eup %2043  ;;  %v629_v6 = vadd.f32 1.0, %v3032_v49  ;;  %v525_v45 = vand.u32 2147483647, %v3030_v57  ;;  %v673_v56 = vsel %vm3042_vm1, %v670_v19, %v667_v0  ;;  %v941_v0 = vpop.xlane.xlu0 %940 }
 0x128   : > { %2055 = vpow2.f32 %v569_v54  ;;  %v3064_v25 = vpop.eup %2045  ;;  %v475_v30 = vmax.f32 %v2892_v18, 0.0  ;;  %v542_v31 = vsub.f32 0.0, %v526_v60  ;;  %v739_v38 = vsel %vm483_vm15, %v2846_v29, %v723_v20  ;;  %v944_v20 = vpop.xlane.xlu1 %943 }
 0x129   : > { %2057 = vtanh.f32 %v736_v17  ;;  %v683_v5 = vadd.f32 1.0, %v3049_v12  ;;  %v1092_v33 = vand.u32 2147483647, %v3047_v26  ;;  %v623_v16 = vmul.f32 -0.5, %v2972_v13 }
 0x12a   : > { %2059 = vlog2.f32 %v674_v59  ;;  %v470_v36 = vmax.f32 %v2900_v28, 0.0  ;;  %v1127_v39 = vmul.f32 1.442695, %v1109_v21  ;;  %v729_v43 = vadd.f32 %v673_v56, %v473_v32 }
 0x12b   : > { %2061 = vtanh.f32 %v738_v62  ;;  %v638_v44 = vadd.f32 1.0, %v3064_v25  ;;  %v541_v47 = vsub.f32 0.0, %v525_v45  ;;  %v677_v11 = vmul.f32 -0.5, %v3011_v48  ;;  %v2048_v15 = vpop.eup %2047 }
 0x12c   : > { %2063 = vtanh.f32 %v744_v10  ;;  %v573_v51 = vmul.f32 1.442695, %v542_v31  ;;  %v3082_v8 = vadd.f32 %v914_v61, %v2821_v1  ;;  %v626_v42 = vand.u32 2147483647, %v2972_v13 }
 0x12d   : > { %2065 = vlog2.f32 %v629_v6  ;;  %v476_v37 = vmax.f32 %v2942_v41, 0.0  ;;  %v1108_v54 = vsub.f32 0.0, %v1092_v33  ;;  %v2050_v50 = vpop.eup %2049  ;;  %v624_v32 = vadd.f32 1.0, %v623_v16 }
 0x12e   : > { %2067 = vtanh.f32 %v739_v38  ;;  %v680_v55 = vand.u32 2147483647, %v3011_v48  ;;  %v745_v59 = vsel %vm489_vm3, %v2852_v9, %v729_v43  ;;  %v571_v60 = vmul.f32 1.442695, %v541_v47 }
 0x12f   : > { %2069 = vlog2.f32 %v683_v5  ;;  %v3093_v3 = vadd.f32 %v941_v0, %v2821_v1  ;;  %v678_v62 = vadd.f32 1.0, %v677_v11  ;;  %v1091_v19 = vand.u32 2147483647, %v3082_v8 }
 0x130   : > { %2071 = vpow2.f32 %v1127_v39  ;;  %v3097_v21 = vadd.f32 %v944_v20, %v2821_v1  ;;  %v3100_v10 = vmul.f32 %v2048_v15, %v2824_v63  ;;  %vm3102_vm4 = vcmp.lt.f32.partialorder %v626_v42, 0.0004427343  ;;  %v984_v15 = vpop.xlane.xlu1 %983 }
 0x131   : > { %2073 = vlog2.f32 %v638_v44  ;;  %v632_v45 = vmul.f32 -0.5, %v3032_v49  ;;  %v1125_v56 = vmul.f32 1.442695, %v1108_v54  ;;  %v625_v38 = vmul.f32 %v2972_v13, %v624_v32 }
 0x132   : > { %2075 = vpow2.f32 %v573_v51  ;;  %v635_v5 = vand.u32 2147483647, %v3032_v49  ;;  %v686_v33 = vmul.f32 -0.5, %v3049_v12  ;;  %vm3112_vm5 = vcmp.lt.f32.partialorder %v680_v55, 0.0004427343 }
 0x133   : > { %v2052_v53 = vpop.eup %2051  ;;  %2077 = vtanh.f32 %v745_v59  ;;  %v1100_v39 = vand.u32 2147483647, %v3093_v3  ;;  %v3118_v44 = vmul.f32 %v2050_v50, %v2827_v4  ;;  %v679_v13 = vmul.f32 %v3011_v48, %v678_v62  ;;  %v923_v62 = vpop.xlane.xlu0 %922 }
 0x134   : > { %v2054_v31 = vpop.eup %2053  ;;  %v622_v16 = vmul.f32 0.6931472, %v2052_v53  ;;  %2079 = vpow2.f32 %v571_v60  ;;  %v1107_v47 = vsub.f32 0.0, %v1091_v19  ;;  %v1101_v11 = vand.u32 2147483647, %v3097_v21 }
 0x135   : > { %v3110_v61 = vpop.eup %2055  ;;  %vm484_vm6 = vcmp.ne.f32.partialorder %v2864_v24, %v2864_v24  ;;  %v633_v42 = vadd.f32 1.0, %v632_v45  ;;  %v689_v54 = vand.u32 2147483647, %v3049_v12  ;;  %2081 = vpow2.f32 %v1125_v56 }
 0x136   : > { %v2058_v43 = vpop.eup %2057  ;;  %v3128_v4 = vmul.f32 %v2054_v31, %v2831_v14  ;;  %vm3130_vm7 = vcmp.lt.f32.partialorder %v635_v5, 0.0004427343  ;;  %v687_v50 = vadd.f32 1.0, %v686_v33  ;;  %v692_v55 = vadd.f32 1.0, %v3110_v61 }
 0x137   : > { %v2060_v51 = vpop.eup %2059  ;;  %v3136_v59 = vmul.f32 %v2058_v43, %v2835_v2  ;;  %v628_v60 = vsel %vm3102_vm4, %v625_v38, %v622_v16  ;;  %v641_v20 = vmul.f32 -0.5, %v3064_v25  ;;  %v1116_v53 = vsub.f32 0.0, %v1100_v39 }
 0x138   : > { %v2062_v32 = vpop.eup %2061  ;;  %4303 = vst [vmem:[#allocation14_spill] sm:$0xff] %v3128_v4  ;;  %v676_v19 = vmul.f32 0.6931472, %v2060_v51  ;;  %v1123_v45 = vmul.f32 1.442695, %v1107_v47  ;;  %v1117_v56 = vsub.f32 0.0, %v1101_v11  ;;  %v3142_v31 = vadd.f32 %v923_v62, %v2821_v1 }
 0x139   : > { %v2064_v0 = vpop.eup %2063  ;;  %v634_v33 = vmul.f32 %v3032_v49, %v633_v42  ;;  %vm3149_vm8 = vcmp.lt.f32.partialorder %v689_v54, 0.0004427343  ;;  %v644_v38 = vand.u32 2147483647, %v3064_v25  ;;  %v724_v43 = vadd.f32 %v628_v60, %v468_v35 }
 0x13a   : > { %v2066_v14 = vpop.eup %2065  ;;  %vm490_vm9 = vcmp.ne.f32.partialorder %v2873_v52, %v2873_v52  ;;  %v688_v47 = vmul.f32 %v3049_v12, %v687_v50  ;;  %2083 = vlog2.f32 %v692_v55  ;;  %v642_v42 = vadd.f32 1.0, %v641_v20 }
 0x13b   : > { %v3144_v5 = vpop.eup %2067  ;;  %v631_v51 = vmul.f32 0.6931472, %v2066_v14  ;;  %v1141_v54 = vmul.f32 1.442695, %v1116_v53  ;;  %v682_v39 = vsel %vm3112_vm5, %v679_v13, %v676_v19  ;;  %2085 = vpow2.f32 %v1123_v45 }
 0x13c   : > { %v2070_v16 = vpop.eup %2069  ;;  %v1143_v35 = vmul.f32 1.442695, %v1117_v56  ;;  %v1094_v60 = vand.u32 2147483647, %v3142_v31  ;;  %vm3170_vm10 = vcmp.lt.f32.partialorder %v644_v38, 0.0004427343  ;;  %v3176_v20 = vadd.f32 %v984_v15, %v2821_v1  ;;  %v981_v38 = vpop.xlane.xlu0 %980 }
 0x13d   : > { %v3161_v49 = vpop.eup %2071  ;;  %v685_v12 = vmul.f32 0.6931472, %v2070_v16  ;;  %v3179_v63 = vmul.f32 %v2062_v32, %v2839_v22  ;;  %v3182_v13 = vmul.f32 %v2064_v0, %v2842_v23  ;;  %v740_v53 = vsel %vm484_vm6, %v2864_v24, %v724_v43 }
 0x13e   : > { %v2074_v62 = vpop.eup %2073  ;;  %vm485_vm11 = vcmp.ne.f32.partialorder %v2883_v27, %v2883_v27  ;;  %v1173_v14 = vadd.f32 1.0, %v3161_v49  ;;  %v730_v15 = vadd.f32 %v682_v39, %v474_v40  ;;  %v637_v22 = vsel %vm3130_vm7, %v634_v33, %v631_v51 }
 0x13f   : > { %v3168_v2 = vpop.eup %2075  ;;  %4310 = vst [vmem:[#allocation15_spill] sm:$0xff] %v3182_v13  ;;  %vm491_vm12 = vcmp.ne.f32.partialorder %v2892_v18, %v2892_v18  ;;  %v643_v23 = vmul.f32 %v3064_v25, %v642_v42  ;;  %2087 = vpow2.f32 %v1141_v54  ;;  %v640_v0 = vmul.f32 0.6931472, %v2074_v62 }
 0x140   : > { %v2078_v19 = vpop.eup %2077  ;;  %v710_v45 = vadd.f32 1.0, %v3168_v2  ;;  %2089 = vpow2.f32 %v1143_v35  ;;  %v1110_v56 = vsub.f32 0.0, %v1094_v60  ;;  %v691_v40 = vsel %vm3149_vm8, %v688_v47, %v685_v12  ;;  %v938_v35 = vpop.xlane.xlu1 %937 }
 0x141   : > { %v3198_v32 = vpop.eup %2079  ;;  %2091 = vtanh.f32 %v740_v53  ;;  %v1476_v48 = vand.u32 2147483647, %v3176_v20  ;;  %v3205_v33 = vadd.f32 %v981_v38, %v2821_v1  ;;  %v3212_v39 = vmul.f32 %v2078_v19, %v2852_v9 }
 0x142   : > { %v3207_v16 = vpop.eup %2081  ;;  %vm486_vm13 = vcmp.ne.f32.partialorder %v2900_v28, %v2900_v28  ;;  %v1045_v43 = vmax.f32 %v2995_v34, 0.0  ;;  %2093 = vlog2.f32 %v1173_v14  ;;  %v746_v6 = vsel %vm490_vm9, %v2873_v52, %v730_v15 }
 0x143   : > { %4311 = vst [vmem:[#allocation16_spill] sm:$0xff] %v3212_v39  ;;  %v725_v47 = vadd.f32 %v637_v22, %v469_v7  ;;  %v695_v51 = vmul.f32 -0.5, %v3110_v61  ;;  %v701_v42 = vadd.f32 1.0, %v3198_v32  ;;  %v731_v9 = vadd.f32 %v691_v40, %v475_v30 }
 0x144   : > { %v646_v54 = vsel %vm3170_vm10, %v643_v23, %v640_v0  ;;  %2095 = vlog2.f32 %v710_v45  ;;  %v1129_v62 = vmul.f32 1.442695, %v1110_v56  ;;  %v1164_v60 = vadd.f32 1.0, %v3207_v16  ;;  %v987_v30 = vpop.xlane.xlu1 %986 }
 0x145   : > { %v1492_v12 = vsub.f32 0.0, %v1476_v48  ;;  %v1475_v53 = vand.u32 2147483647, %v3205_v33  ;;  %v3232_v7 = vadd.f32 %v938_v35, %v2821_v1  ;;  %v3236_v14 = vmul.f32 %v3144_v5, %v2846_v29 }
 0x146   : > { %2097 = vtanh.f32 %v746_v6  ;;  %v741_v15 = vsel %vm485_vm11, %v2883_v27, %v725_v47  ;;  %v726_v22 = vadd.f32 %v646_v54, %v470_v36  ;;  %v696_v23 = vadd.f32 1.0, %v695_v51 }
 0x147   : > { %v2084_v19 = vpop.eup %2083  ;;  %2099 = vlog2.f32 %v701_v42  ;;  %v747_v29 = vsel %vm491_vm12, %v2892_v18, %v731_v9  ;;  %v698_v5 = vand.u32 2147483647, %v3110_v61  ;;  %v713_v0 = vmul.f32 -0.5, %v3168_v2 }
 0x148   : > { %2101 = vpow2.f32 %v1129_v62  ;;  %v3253_v45 = vpop.eup %2085  ;;  %v1509_v56 = vmul.f32 1.442695, %v1492_v12  ;;  %v1491_v38 = vsub.f32 0.0, %v1475_v53  ;;  %v1099_v40 = vand.u32 2147483647, %v3232_v7  ;;  %v926_v12 = vpop.xlane.xlu0 %925 }
 0x149   : > { %2103 = vlog2.f32 %v1164_v60  ;;  %v694_v36 = vmul.f32 0.6931472, %v2084_v19  ;;  %v1176_v48 = vmul.f32 -0.5, %v3161_v49  ;;  %v742_v47 = vsel %vm486_vm13, %v2900_v28, %v726_v22 }
 0x14a   : > { %2105 = vtanh.f32 %v741_v15  ;;  %v697_v51 = vmul.f32 %v3110_v61, %v696_v23  ;;  %vm492_vm14 = vcmp.ne.f32.partialorder %v2942_v41, %v2942_v41  ;;  %v714_v54 = vadd.f32 1.0, %v713_v0 }
 0x14b   : > { %2107 = vtanh.f32 %v747_v29  ;;  %v716_v62 = vand.u32 2147483647, %v3168_v2  ;;  %v704_v35 = vmul.f32 -0.5, %v3198_v32  ;;  %v1155_v60 = vadd.f32 1.0, %v3253_v45 }
 0x14c   : > { %v3264_v9 = vpop.eup %2087  ;;  %vm3273_vm15 = vcmp.lt.f32.partialorder %v698_v5, 0.0004427343  ;;  %2109 = vpow2.f32 %v1509_v56  ;;  %v1507_v61 = vmul.f32 1.442695, %v1491_v38  ;;  %v1115_v15 = vsub.f32 0.0, %v1099_v40 }
 0x14d   : > { %v3271_v53 = vpop.eup %2089  ;;  %2111 = vtanh.f32 %v742_v47  ;;  %v700_v23 = vsel %vm3273_vm15, %v697_v51, %v694_v36  ;;  %v707_v29 = vand.u32 2147483647, %v3198_v32  ;;  %v1177_v0 = vadd.f32 1.0, %v1176_v48 }
 0x14e   : > { %v3277_v22 = vpop.eup %2091  ;;  %v1179_v11 = vand.u32 2147483647, %v3161_v49  ;;  %v1236_v5 = vadd.f32 1.0, %v3264_v9  ;;  %v3286_v56 = vadd.f32 %v987_v30, %v2821_v1  ;;  %v3289_v38 = vmul.f32 %v3168_v2, %v714_v54 }
 0x14f   : > { %v2094_v25 = vpop.eup %2093  ;;  %vm3291_vm0 = vcmp.lt.f32.partialorder %v716_v62, 0.0004427343  ;;  %v705_v36 = vadd.f32 1.0, %v704_v35  ;;  %2113 = vlog2.f32 %v1155_v60  ;;  %v1245_v48 = vadd.f32 1.0, %v3271_v53  ;;  %v947_v35 = vpop.xlane.xlu0 %946 }
 0x150   : > { %v732_v51 = vadd.f32 %v700_v23, %v476_v37  ;;  %v1167_v19 = vmul.f32 -0.5, %v3207_v16  ;;  %2115 = vpow2.f32 %v1507_v61  ;;  %v1139_v30 = vmul.f32 1.442695, %v1115_v15 }
 0x151   : > { %v2096_v47 = vpop.eup %2095  ;;  %vm3299_vm1 = vcmp.lt.f32.partialorder %v707_v29, 0.0004427343  ;;  %vm1061_vm3 = vcmp.ne.f32.partialorder %v2995_v34, %v2995_v34  ;;  %v1175_v2 = vmul.f32 0.6931472, %v2094_v25  ;;  %v1178_v54 = vmul.f32 %v3161_v49, %v1177_v0 }
 0x152   : > { %v3307_v62 = vadd.f32 %v926_v12, %v2821_v1  ;;  %vm3309_vm4 = vcmp.lt.f32.partialorder %v1179_v11, 0.0004427343  ;;  %2117 = vlog2.f32 %v1236_v5  ;;  %v1477_v61 = vand.u32 2147483647, %v3286_v56 }
 0x153   : > { %v2098_v60 = vpop.eup %2097  ;;  %v3315_v15 = vadd.f32 %v947_v35, %v2821_v1  ;;  %v706_v25 = vmul.f32 %v3198_v32, %v705_v36  ;;  %v1170_v49 = vand.u32 2147483647, %v3207_v16  ;;  %2119 = vlog2.f32 %v1245_v48 }
 0x154   : > { %v2100_v23 = vpop.eup %2099  ;;  %v748_v11 = vsel %vm492_vm14, %v2942_v41, %v732_v51  ;;  %v712_v0 = vmul.f32 0.6931472, %v2096_v47  ;;  %v1168_v5 = vadd.f32 1.0, %v1167_v19  ;;  %2121 = vpow2.f32 %v1139_v30 }
 0x155   : > { %v3320_v29 = vpop.eup %2101  ;;  %v3327_v6 = vmul.f32 %v2098_v60, %v2873_v52  ;;  %v1181_v32 = vsel %vm3309_vm4, %v1178_v54, %v1175_v2  ;;  %v1158_v36 = vmul.f32 -0.5, %v3253_v45  ;;  %v1095_v48 = vand.u32 2147483647, %v3307_v62  ;;  %v1005_v60 = vpop.xlane.xlu0 %1004 }
 0x156   : > { %v2104_v35 = vpop.eup %2103  ;;  %vm494_vm5 = vcmp.ne.f32.partialorder %v3009_v46, %v3009_v46  ;;  %v703_v51 = vmul.f32 0.6931472, %v2100_v23  ;;  %v1493_v19 = vsub.f32 0.0, %v1477_v61  ;;  %v1102_v30 = vand.u32 2147483647, %v3315_v15 }
 0x157   : > { %4320 = vst [vmem:[#allocation17_spill] sm:$0xff] %v3327_v6  ;;  %v3333_v12 = vpop.eup %2105  ;;  %2123 = vtanh.f32 %v748_v11  ;;  %vm3339_vm6 = vcmp.lt.f32.partialorder %v1170_v49, 0.0004427343  ;;  %v1161_v2 = vand.u32 2147483647, %v3253_v45  ;;  %v1182_v54 = vadd.f32 1.0, %v3320_v29  ;;  %v1008_v11 = vpop.xlane.xlu1 %1007 }
 0x158   : > { %v2108_v52 = vpop.eup %2107  ;;  %v718_v37 = vsel %vm3291_vm0, %v3289_v38, %v712_v0  ;;  %vm493_vm7 = vcmp.ne.f32.partialorder %v3030_v57, %v3030_v57  ;;  %v1301_v61 = vadd.f32 %v1181_v32, %v1045_v43  ;;  %vm1060_vm8 = vcmp.ne.f32.partialorder %v3047_v26, %v3047_v26 }
 0x159   : > { %v1166_v23 = vmul.f32 0.6931472, %v2104_v35  ;;  %v1169_v49 = vmul.f32 %v3207_v16, %v1168_v5  ;;  %v3355_v47 = vpop.eup %2109  ;;  %v1159_v50 = vadd.f32 1.0, %v1158_v36  ;;  %v1239_v55 = vmul.f32 -0.5, %v3264_v9 }
 0x15a   : > { %v1111_v40 = vsub.f32 0.0, %v1095_v48  ;;  %v3359_v38 = vadd.f32 %v1008_v11, %v2821_v1  ;;  %v3361_v0 = vpop.eup %2111  ;;  %v709_v43 = vsel %vm3299_vm1, %v706_v25, %v703_v51  ;;  %v1248_v32 = vmul.f32 -0.5, %v3271_v53  ;;  %v929_v48 = vpop.xlane.xlu0 %928 }
 0x15b   : > { %v1511_v35 = vmul.f32 1.442695, %v1493_v19  ;;  %v1118_v17 = vsub.f32 0.0, %v1102_v30  ;;  %v3367_v16 = vmul.f32 %v2108_v52, %v2892_v18  ;;  %v4324_v5 = vmax.f32 %v3009_v46, 0.0 }
 0x15c   : > { %vm3371_vm9 = vcmp.lt.f32.partialorder %v1161_v2, 0.0004427343  ;;  %2125 = vlog2.f32 %v1182_v54  ;;  %v2114_v11 = vpop.eup %2113  ;;  %v1317_v42 = vsel %vm1061_vm3, %v2995_v34, %v1301_v61  ;;  %v1172_v25 = vsel %vm3339_vm6, %v1169_v49, %v1166_v23 }
 0x15d   : > { %4323 = vst [vmem:[#allocation18_spill] sm:$0xff] %v3367_v16  ;;  %v734_v36 = vadd.f32 %v718_v37, %v4324_v5  ;;  %v1242_v18 = vand.u32 2147483647, %v3264_v9  ;;  %v1548_v51 = vadd.f32 1.0, %v3355_v47  ;;  %v3383_v19 = vpop.eup %2115  ;;  %v4327_v30 = vmax.f32 %v3030_v57, 0.0 }
 0x15e   : > { %v1160_v2 = vmul.f32 %v3253_v45, %v1159_v50  ;;  %v1131_v54 = vmul.f32 1.442695, %v1111_v40  ;;  %v1484_v37 = vand.u32 2147483647, %v3359_v38  ;;  %v1240_v5 = vadd.f32 1.0, %v1239_v55 }
 0x15f   : > { %v733_v52 = vadd.f32 %v709_v43, %v4327_v30  ;;  %v1249_v39 = vadd.f32 1.0, %v1248_v32  ;;  %2127 = vpow2.f32 %v1511_v35  ;;  %v1145_v61 = vmul.f32 1.442695, %v1118_v17  ;;  %v2118_v23 = vpop.eup %2117 }
 0x160   : > { %v750_v49 = vsel %vm494_vm5, %v3009_v46, %v734_v36  ;;  %2129 = vtanh.f32 %v1317_v42  ;;  %v4328_v13 = vmax.f32 %v3047_v26, 0.0  ;;  %vm1059_vm10 = vcmp.ne.f32.partialorder %v3082_v8, %v3082_v8  ;;  %v2120_v45 = vpop.eup %2119 }
 0x161   : > { %v1157_v50 = vmul.f32 0.6931472, %v2114_v11  ;;  %vm3397_vm11 = vcmp.lt.f32.partialorder %v1242_v18, 0.0004427343  ;;  %2131 = vlog2.f32 %v1548_v51  ;;  %v1539_v17 = vadd.f32 1.0, %v3383_v19  ;;  %v3405_v32 = vpop.eup %2121  ;;  %v950_v18 = vpop.xlane.xlu1 %949 }
 0x162   : > { %v1300_v43 = vadd.f32 %v1172_v25, %v4328_v13  ;;  %v3403_v40 = vadd.f32 %v1005_v60, %v2821_v1  ;;  %v749_v13 = vsel %vm493_vm7, %v3030_v57, %v733_v52  ;;  %v1251_v35 = vand.u32 2147483647, %v3271_v53 }
 0x163   : > { %2133 = vpow2.f32 %v1131_v54  ;;  %v1500_v36 = vsub.f32 0.0, %v1484_v37  ;;  %v1241_v11 = vmul.f32 %v3264_v9, %v1240_v5  ;;  %v1250_v42 = vmul.f32 %v3271_v53, %v1249_v39 }
 0x164   : > { %v1185_v25 = vmul.f32 -0.5, %v3320_v29  ;;  %2135 = vpow2.f32 %v1145_v61  ;;  %v1316_v51 = vsel %vm1060_vm8, %v3047_v26, %v1300_v43  ;;  %v1163_v30 = vsel %vm3371_vm9, %v1160_v2, %v1157_v50  ;;  %v3426_v39 = vpop.eup %2123 }
 0x165   : > { %vm1068_vm12 = vcmp.ne.f32.partialorder %v3093_v3, %v3093_v3  ;;  %v1238_v52 = vmul.f32 0.6931472, %v2118_v23  ;;  %v3424_v9 = vadd.f32 %v950_v18, %v2821_v1  ;;  %4332 = vst [vmem:[#allocation20_spill] sm:$0xff] %v3426_v39  ;;  %vm1069_vm13 = vcmp.ne.f32.partialorder %v3097_v21, %v3097_v21 }
 0x166   : > { %v1247_v53 = vmul.f32 0.6931472, %v2120_v45  ;;  %2137 = vlog2.f32 %v1539_v17  ;;  %v1227_v54 = vadd.f32 1.0, %v3405_v32  ;;  %v1483_v37 = vand.u32 2147483647, %v3403_v40 }
 0x167   : > { %4331 = vst [vmem:[#allocation19_spill] sm:$0xff] %v3424_v9  ;;  %2139 = vtanh.f32 %v750_v49  ;;  %vm3432_vm14 = vcmp.lt.f32.partialorder %v1251_v35, 0.0004427343  ;;  %v1551_v5 = vmul.f32 -0.5, %v3355_v47  ;;  %v1525_v61 = vmul.f32 1.442695, %v1500_v36 }
 0x168   : > { %2141 = vtanh.f32 %v749_v13  ;;  %v4335_v60 = vmax.f32 %v3082_v8, 0.0  ;;  %v1188_v43 = vand.u32 2147483647, %v3320_v29  ;;  %v1244_v45 = vsel %vm3397_vm11, %v1241_v11, %v1238_v52 }
 0x169   : > { %2143 = vtanh.f32 %v1316_v51  ;;  %v1186_v49 = vadd.f32 1.0, %v1185_v25  ;;  %v3444_v17 = vadd.f32 %v929_v48, %v2821_v1  ;;  %v2126_v35 = vpop.eup %2125  ;;  %v1253_v36 = vsel %vm3432_vm14, %v1250_v42, %v1247_v53 }
 0x16a   : > { %v1299_v23 = vadd.f32 %v1163_v30, %v4335_v60  ;;  %2145 = vlog2.f32 %v1227_v54  ;;  %v1499_v13 = vsub.f32 0.0, %v1483_v37  ;;  %v1103_v18 = vand.u32 2147483647, %v3424_v9 }
 0x16b   : > { %v1552_v30 = vadd.f32 1.0, %v1551_v5  ;;  %v1554_v60 = vand.u32 2147483647, %v3355_v47  ;;  %2147 = vpow2.f32 %v1525_v61  ;;  %v4336_v11 = vmax.f32 %v3093_v3, 0.0 }
 0x16c   : > { %v1315_v55 = vsel %vm1059_vm10, %v3082_v8, %v1299_v23  ;;  %vm3457_vm15 = vcmp.lt.f32.partialorder %v1188_v43, 0.0004427343  ;;  %v3462_v53 = vpop.eup %2127  ;;  %v4339_v54 = vmax.f32 %v3097_v21, 0.0  ;;  %v1184_v48 = vmul.f32 0.6931472, %v2126_v35 }
 0x16d   : > { %v1308_v25 = vadd.f32 %v1244_v45, %v4336_v11  ;;  %v1542_v2 = vmul.f32 -0.5, %v3383_v19  ;;  %v2130_v61 = vpop.eup %2129  ;;  %vm1062_vm0 = vcmp.ne.f32.partialorder %v3142_v31, %v3142_v31  ;;  %v1187_v23 = vmul.f32 %v3320_v29, %v1186_v49 }
 0x16e   : > { %v1309_v37 = vadd.f32 %v1253_v36, %v4339_v54  ;;  %v1523_v43 = vmul.f32 1.442695, %v1499_v13  ;;  %v1119_v45 = vsub.f32 0.0, %v1103_v18  ;;  %v1096_v11 = vand.u32 2147483647, %v3444_v17  ;;  %v2132_v52 = vpop.eup %2131  ;;  %v1011_v54 = vpop.xlane.xlu1 %1010 }
 0x16f   : > { %2149 = vtanh.f32 %v1315_v55  ;;  %v1553_v51 = vmul.f32 %v3355_v47, %v1552_v30  ;;  %vm3473_vm1 = vcmp.lt.f32.partialorder %v1554_v60, 0.0004427343  ;;  %v1324_v29 = vsel %vm1068_vm12, %v3093_v3, %v1308_v25 }
 0x170   : > { %v3478_v5 = vpop.eup %2133  ;;  %v1557_v49 = vadd.f32 1.0, %v3462_v53  ;;  %v3487_v47 = vadd.f32 %v1011_v54, %v2821_v1  ;;  %v1325_v30 = vsel %vm1069_vm13, %v3097_v21, %v1309_v37  ;;  %v1543_v60 = vadd.f32 1.0, %v1542_v2  ;;  %v990_v54 = vpop.xlane.xlu0 %989 }
 0x171   : > { %v3489_v18 = vpop.eup %2135  ;;  %v1545_v55 = vand.u32 2147483647, %v3383_v19  ;;  %v1230_v36 = vmul.f32 -0.5, %v3405_v32  ;;  %v1190_v25 = vsel %vm3457_vm15, %v1187_v23, %v1184_v48  ;;  %2151 = vpow2.f32 %v1523_v43 }
 0x172   : > { %4342 = vst [vmem:[#allocation21_spill] sm:$0xff] %v3487_v47  ;;  %v1147_v13 = vmul.f32 1.442695, %v1119_v45  ;;  %v1112_v50 = vsub.f32 0.0, %v1096_v11  ;;  %2153 = vtanh.f32 %v1324_v29  ;;  %vm1444_vm3 = vcmp.ne.f32.partialorder %v3176_v20, %v3176_v20 }
 0x173   : > { %v2138_v4 = vpop.eup %2137  ;;  %v1550_v16 = vmul.f32 0.6931472, %v2132_v52  ;;  %v1191_v37 = vadd.f32 1.0, %v3478_v5  ;;  %v3503_v2 = vadd.f32 %v990_v54, %v2821_v1  ;;  %v3508_v42 = vmul.f32 %v2130_v61, %v2995_v34  ;;  %v953_v61 = vpop.xlane.xlu1 %952 }
 0x174   : > { %v3505_v6 = vpop.eup %2139  ;;  %2155 = vlog2.f32 %v1557_v49  ;;  %v1254_v48 = vadd.f32 1.0, %v3489_v18  ;;  %v1485_v23 = vand.u32 2147483647, %v3487_v47  ;;  %v4346_v52 = vmax.f32 %v3142_v31, 0.0 }
 0x175   : > { %4343 = vst [vmem:[#allocation22_spill] sm:$0xff] %v3505_v6  ;;  %4344 = vst [vmem:[#allocation23_spill] sm:$0xff] %v3508_v42  ;;  %v3512_v43 = vpop.eup %2141  ;;  %2157 = vtanh.f32 %v1325_v30  ;;  %v1544_v11 = vmul.f32 %v3383_v19, %v1543_v60  ;;  %v1233_v29 = vand.u32 2147483647, %v3405_v32  ;;  %v1541_v6 = vmul.f32 0.6931472, %v2138_v4 }
 0x176   : > { %4345 = vst [vmem:[#allocation24_spill] sm:$0xff] %v3512_v43  ;;  %v1302_v45 = vadd.f32 %v1190_v25, %v4346_v52  ;;  %v2144_v54 = vpop.eup %2143  ;;  %v1231_v46 = vadd.f32 1.0, %v1230_v36  ;;  %2159 = vpow2.f32 %v1147_v13  ;;  %v1133_v34 = vmul.f32 1.442695, %v1112_v50 }
 0x177   : > { %v2146_v49 = vpop.eup %2145  ;;  %v1556_v57 = vsel %vm3473_vm1, %v1553_v51, %v1550_v16  ;;  %vm1443_vm4 = vcmp.ne.f32.partialorder %v3205_v33, %v3205_v33  ;;  %vm3522_vm5 = vcmp.lt.f32.partialorder %v1545_v55, 0.0004427343  ;;  %2161 = vlog2.f32 %v1191_v37  ;;  %v932_v55 = vpop.xlane.xlu0 %931 }
 0x178   : > { %v1478_v19 = vand.u32 2147483647, %v3503_v2  ;;  %v3527_v60 = vpop.eup %2147  ;;  %2163 = vlog2.f32 %v1254_v48  ;;  %v1501_v36 = vsub.f32 0.0, %v1485_v23  ;;  %v3532_v16 = vmul.f32 %v2144_v54, %v3047_v26 }
 0x179   : > { %v1318_v51 = vsel %vm1062_vm0, %v3142_v31, %v1302_v45  ;;  %vm3538_vm6 = vcmp.lt.f32.partialorder %v1233_v29, 0.0004427343  ;;  %v1194_v13 = vmul.f32 -0.5, %v3478_v5  ;;  %v4352_v25 = vmax.f32 %v3176_v20, 0.0 }
 0x17a   : > { %4349 = vst [vmem:[#allocation25_spill] sm:$0xff] %v3532_v16  ;;  %v1547_v48 = vsel %vm3522_vm5, %v1544_v11, %v1541_v6  ;;  %v1232_v26 = vmul.f32 %v3405_v32, %v1231_v46  ;;  %2165 = vpow2.f32 %v1133_v34  ;;  %vm1067_vm7 = vcmp.ne.f32.partialorder %v3232_v7, %v3232_v7  ;;  %v1014_v46 = vpop.xlane.xlu1 %1013 }
 0x17b   : > { %v1684_v37 = vadd.f32 %v1556_v57, %v4352_v25  ;;  %v1229_v23 = vmul.f32 0.6931472, %v2146_v49  ;;  %v1620_v52 = vadd.f32 1.0, %v3527_v60  ;;  %v1494_v45 = vsub.f32 0.0, %v1478_v19  ;;  %v993_v16 = vpop.xlane.xlu0 %992 }
 0x17c   : > { %v3552_v29 = vadd.f32 %v953_v61, %v2821_v1  ;;  %v2150_v54 = vpop.eup %2149  ;;  %v1560_v4 = vmul.f32 -0.5, %v3462_v53  ;;  %v1527_v30 = vmul.f32 1.442695, %v1501_v36  ;;  %v3557_v6 = vadd.f32 %v932_v55, %v2821_v1 }
 0x17d   : > { %2167 = vtanh.f32 %v1318_v51  ;;  %v1195_v32 = vadd.f32 1.0, %v1194_v13  ;;  %v1197_v11 = vand.u32 2147483647, %v3478_v5  ;;  %v3561_v34 = vadd.f32 %v1014_v46, %v2821_v1 }
 0x17e   : > { %v1700_v49 = vsel %vm1444_vm3, %v3176_v20, %v1684_v37  ;;  %v4353_v19 = vmax.f32 %v3205_v33, 0.0  ;;  %v1563_v55 = vand.u32 2147483647, %v3462_v53  ;;  %v3571_v25 = vpop.eup %2151  ;;  %v1235_v51 = vsel %vm3538_vm6, %v1232_v26, %v1229_v23 }
 0x17f   : > { %2169 = vlog2.f32 %v1620_v52  ;;  %v1513_v13 = vmul.f32 1.442695, %v1494_v45  ;;  %v1104_v46 = vand.u32 2147483647, %v3552_v29  ;;  %v2154_v61 = vpop.eup %2153  ;;  %v1561_v57 = vadd.f32 1.0, %v1560_v4 }
 0x180   : > { %v1683_v36 = vadd.f32 %v1547_v48, %v4353_v19  ;;  %v1257_v50 = vmul.f32 -0.5, %v3489_v18  ;;  %2171 = vpow2.f32 %v1527_v30  ;;  %v1097_v37 = vand.u32 2147483647, %v3557_v6 }
 0x181   : > { %v2156_v42 = vpop.eup %2155  ;;  %v3579_v48 = vmul.f32 %v2150_v54, %v3082_v8  ;;  %v3582_v19 = vmul.f32 %v3478_v5, %v1195_v32  ;;  %vm3584_vm8 = vcmp.lt.f32.partialorder %v1197_v11, 0.0004427343  ;;  %v1486_v26 = vand.u32 2147483647, %v3561_v34 }
 0x182   : > { %v2158_v23 = vpop.eup %2157  ;;  %2173 = vtanh.f32 %v1700_v49  ;;  %v1699_v4 = vsel %vm1443_vm4, %v3205_v33, %v1683_v36  ;;  %v4357_v52 = vmax.f32 %v3232_v7, 0.0  ;;  %v1611_v45 = vadd.f32 1.0, %v3571_v25 }
 0x183   : > { %4354 = vst [vmem:[#allocation26_spill] sm:$0xff] %v3579_v48  ;;  %v3596_v5 = vpop.eup %2159  ;;  %vm3598_vm9 = vcmp.lt.f32.partialorder %v1563_v55, 0.0004427343  ;;  %2175 = vpow2.f32 %v1513_v13  ;;  %v1120_v32 = vsub.f32 0.0, %v1104_v46  ;;  %vm1445_vm10 = vcmp.ne.f32.partialorder %v3286_v56, %v3286_v56 }
 0x184   : > { %v1307_v8 = vadd.f32 %v1235_v51, %v4357_v52  ;;  %v2162_v11 = vpop.eup %2161  ;;  %v1559_v49 = vmul.f32 0.6931472, %v2156_v42  ;;  %v1562_v36 = vmul.f32 %v3462_v53, %v1561_v57  ;;  %v1258_v51 = vadd.f32 1.0, %v1257_v50 }
 0x185   : > { %v1113_v52 = vsub.f32 0.0, %v1097_v37  ;;  %v2164_v48 = vpop.eup %2163  ;;  %v3607_v55 = vmul.f32 %v2154_v61, %v3093_v3  ;;  %2177 = vtanh.f32 %v1699_v4  ;;  %v1260_v43 = vand.u32 2147483647, %v3489_v18  ;;  %v956_v37 = vpop.xlane.xlu1 %955 }
 0x186   : > { %v1502_v30 = vsub.f32 0.0, %v1486_v26  ;;  %v1323_v13 = vsel %vm1067_vm7, %v3232_v7, %v1307_v8  ;;  %v1623_v42 = vmul.f32 -0.5, %v3527_v60  ;;  %2179 = vlog2.f32 %v1611_v45 }
 0x187   : > { %4360 = vst [vmem:[#allocation27_spill] sm:$0xff] %v3607_v55  ;;  %v1263_v53 = vadd.f32 1.0, %v3596_v5  ;;  %v3616_v50 = vpop.eup %2165  ;;  %v3619_v57 = vmul.f32 %v2158_v23, %v3097_v21  ;;  %v1193_v3 = vmul.f32 0.6931472, %v2162_v11  ;;  %v1149_v61 = vmul.f32 1.442695, %v1120_v32 }
 0x188   : > { %v3622_v46 = vadd.f32 %v993_v16, %v2821_v1  ;;  %v1565_v26 = vsel %vm3598_vm9, %v1562_v36, %v1559_v49  ;;  %vm1070_vm11 = vcmp.ne.f32.partialorder %v3315_v15, %v3315_v15  ;;  %v1256_v4 = vmul.f32 0.6931472, %v2164_v48 }
 0x189   : > { %4361 = vst [vmem:[#allocation28_spill] sm:$0xff] %v3619_v57  ;;  %v1259_v8 = vmul.f32 %v3489_v18, %v1258_v51  ;;  %v1135_v45 = vmul.f32 1.442695, %v1113_v52  ;;  %2181 = vtanh.f32 %v1323_v13  ;;  %vm1063_vm12 = vcmp.ne.f32.partialorder %v3307_v62, %v3307_v62 }
 0x18a   : > { %vm3632_vm13 = vcmp.lt.f32.partialorder %v1260_v43, 0.0004427343  ;;  %v1529_v16 = vmul.f32 1.442695, %v1502_v30  ;;  %v2168_v23 = vpop.eup %2167  ;;  %v1624_v54 = vadd.f32 1.0, %v1623_v42  ;;  %2183 = vlog2.f32 %v1263_v53  ;;  %v3654_v53 = vpop.xlane.xlu0 %934 }
 0x18b   : > { %v1200_v32 = vadd.f32 1.0, %v3616_v50  ;;  %v3638_v48 = vadd.f32 %v956_v37, %v2821_v1  ;;  %v1199_v18 = vsel %vm3584_vm8, %v3582_v19, %v1193_v3  ;;  %v4364_v11 = vmax.f32 %v3286_v56, 0.0  ;;  %4365 = vst [vmem:[#allocation29_spill] sm:$0xff] %v3654_v53 }
 0x18c   : > { %2185 = vpow2.f32 %v1149_v61  ;;  %v1479_v43 = vand.u32 2147483647, %v3622_v46  ;;  %v2170_v36 = vpop.eup %2169  ;;  %v1262_v51 = vsel %vm3632_vm13, %v1259_v8, %v1256_v4  ;;  %v1626_v35 = vand.u32 2147483647, %v3527_v60 }
 0x18d   : > { %v1685_v49 = vadd.f32 %v1565_v26, %v4364_v11  ;;  %2187 = vpow2.f32 %v1135_v45  ;;  %v3650_v13 = vpop.eup %2171  ;;  %v1614_v19 = vmul.f32 -0.5, %v3571_v25  ;;  %v3657_v3 = vmul.f32 %v2168_v23, %v3142_v31  ;;  %v1017_v31 = vpop.xlane.xlu1 %1016 }
 0x18e   : > { %2189 = vpow2.f32 %v1529_v16  ;;  %v1495_v42 = vsub.f32 0.0, %v1479_v43  ;;  %v4366_v61 = vmax.f32 %v3307_v62, 0.0  ;;  %v1105_v26 = vand.u32 2147483647, %v3638_v48 }
 0x18f   : > { %2191 = vlog2.f32 %v1200_v32  ;;  %v2174_v4 = vpop.eup %2173  ;;  %v1701_v8 = vsel %vm1445_vm10, %v3286_v56, %v1685_v49  ;;  %v4367_v45 = vmax.f32 %v3315_v15, 0.0  ;;  %v1625_v16 = vmul.f32 %v3527_v60, %v1624_v54 }
 0x190   : > { %v1303_v37 = vadd.f32 %v1199_v18, %v4366_v61  ;;  %v1515_v11 = vmul.f32 1.442695, %v1495_v42  ;;  %v3669_v23 = vpop.eup %2175  ;;  %vm1452_vm14 = vcmp.ne.f32.partialorder %v3359_v38, %v3359_v38  ;;  %v1622_v32 = vmul.f32 0.6931472, %v2170_v36 }
 0x191   : > { %v1310_v21 = vadd.f32 %v1262_v51, %v4367_v45  ;;  %v1629_v18 = vadd.f32 1.0, %v3650_v13  ;;  %v1121_v43 = vsub.f32 0.0, %v1105_v26  ;;  %v3675_v61 = vadd.f32 %v1017_v31, %v2821_v1  ;;  %v996_v31 = vpop.xlane.xlu0 %995 }
 0x192   : > { %vm3677_vm15 = vcmp.lt.f32.partialorder %v1626_v35, 0.0004427343  ;;  %v1615_v51 = vadd.f32 1.0, %v1614_v19  ;;  %2193 = vpow2.f32 %v1515_v11  ;;  %v2178_v54 = vpop.eup %2177  ;;  %v3684_v45 = vmul.f32 %v2174_v4, %v3176_v20 }
 0x193   : > { %v1617_v36 = vand.u32 2147483647, %v3571_v25  ;;  %v1151_v26 = vmul.f32 1.442695, %v1121_v43  ;;  %v2180_v30 = vpop.eup %2179  ;;  %2195 = vtanh.f32 %v1701_v8  ;;  %v1326_v35 = vsel %vm1070_vm11, %v3315_v15, %v1310_v21 }
 0x194   : > { %4370 = vst [vmem:[#allocation30_spill] sm:$0xff] %v3684_v45  ;;  %v1266_v19 = vmul.f32 -0.5, %v3596_v5  ;;  %v1566_v11 = vadd.f32 1.0, %v3669_v23  ;;  %v1319_v20 = vsel %vm1063_vm12, %v3307_v62, %v1303_v37  ;;  %v1628_v4 = vsel %vm3677_vm15, %v1625_v16, %v1622_v32 }
 0x195   : > { %2197 = vlog2.f32 %v1629_v18  ;;  %v1487_v8 = vand.u32 2147483647, %v3675_v61  ;;  %v3701_v43 = vmul.f32 %v2178_v54, %v3205_v33  ;;  %v1616_v21 = vmul.f32 %v3571_v25, %v1615_v51  ;;  %v999_v25 = vpop.xlane.xlu1 %998 }
 0x196   : > { %v1269_v39 = vand.u32 2147483647, %v3596_v5  ;;  %2199 = vpow2.f32 %v1151_v26  ;;  %v2182_v42 = vpop.eup %2181  ;;  %vm1451_vm0 = vcmp.ne.f32.partialorder %v3403_v40, %v3403_v40  ;;  %v1613_v37 = vmul.f32 0.6931472, %v2180_v30 }
 0x197   : > { %2201 = vtanh.f32 %v1326_v35  ;;  %v1203_v49 = vmul.f32 -0.5, %v3616_v50  ;;  %v3709_v16 = vadd.f32 %v996_v31, %v2821_v1  ;;  %v2184_v32 = vpop.eup %2183  ;;  %v4371_v33 = vmax.f32 %v3359_v38, 0.0 }
 0x198   : > { %vm3713_vm1 = vcmp.lt.f32.partialorder %v1617_v36, 0.0004427343  ;;  %v1267_v51 = vadd.f32 1.0, %v1266_v19  ;;  %2203 = vlog2.f32 %v1566_v11  ;;  %v1503_v35 = vsub.f32 0.0, %v1487_v8 }
 0x199   : > { %v1692_v18 = vadd.f32 %v1628_v4, %v4371_v33  ;;  %v3717_v54 = vpop.eup %2185  ;;  %2205 = vtanh.f32 %v1319_v20  ;;  %vm3724_vm3 = vcmp.lt.f32.partialorder %v1269_v39, 0.0004427343  ;;  %v1206_v36 = vand.u32 2147483647, %v3616_v50 }
 0x19a   : > { %v3721_v31 = vpop.eup %2187  ;;  %v1619_v20 = vsel %vm3713_vm1, %v1616_v21, %v1613_v37  ;;  %v1204_v33 = vadd.f32 1.0, %v1203_v49  ;;  %v1480_v26 = vand.u32 2147483647, %v3709_v16  ;;  %v1268_v60 = vmul.f32 %v3596_v5, %v1267_v51 }
 0x19b   : > { %v3730_v11 = vpop.eup %2189  ;;  %v1209_v8 = vadd.f32 1.0, %v3721_v31  ;;  %v1708_v39 = vsel %vm1452_vm14, %v3359_v38, %v1692_v18  ;;  %v1272_v19 = vadd.f32 1.0, %v3717_v54  ;;  %vm1071_vm4 = vcmp.ne.f32.partialorder %v3424_v9, %v3424_v9 }
 0x19c   : > { %v2192_v30 = vpop.eup %2191  ;;  %v1265_v21 = vmul.f32 0.6931472, %v2184_v32  ;;  %v1632_v37 = vmul.f32 -0.5, %v3650_v13  ;;  %v1531_v49 = vmul.f32 1.442695, %v1503_v35  ;;  %v3747_v53 = vmul.f32 %v2182_v42, %v3232_v7 }
 0x19d   : > { %2207 = vlog2.f32 %v1209_v8  ;;  %v4377_v18 = vmax.f32 %v3403_v40, 0.0  ;;  %vm3751_vm5 = vcmp.lt.f32.partialorder %v1206_v36, 0.0004427343  ;;  %v1638_v51 = vadd.f32 1.0, %v3730_v11 }
 0x19e   : > { %4376 = vst [vmem:[#allocation31_spill] sm:$0xff] %v3747_v53  ;;  %2209 = vtanh.f32 %v1708_v39  ;;  %vm1064_vm6 = vcmp.ne.f32.partialorder %v3444_v17, %v3444_v17  ;;  %v1202_v32 = vmul.f32 0.6931472, %v2192_v30  ;;  %v1205_v35 = vmul.f32 %v3616_v50, %v1204_v33 }
 0x19f   : > { %v1691_v57 = vadd.f32 %v1619_v20, %v4377_v18  ;;  %v3756_v52 = vpop.eup %2193  ;;  %v1496_v7 = vsub.f32 0.0, %v1480_v26  ;;  %v1569_v42 = vmul.f32 -0.5, %v3669_v23  ;;  %2211 = vlog2.f32 %v1272_v19  ;;  %v3806_v26 = vpop.xlane.xlu0 %958 }
 0x1a0   : > { %v1575_v36 = vadd.f32 1.0, %v3756_v52  ;;  %v3764_v20 = vadd.f32 %v999_v25, %v2821_v1  ;;  %v2196_v8 = vpop.eup %2195  ;;  %v1271_v18 = vsel %vm3724_vm3, %v1268_v60, %v1265_v21  ;;  %v1633_v39 = vadd.f32 1.0, %v1632_v37  ;;  %4386 = vst [vmem:[#allocation32_spill] sm:$0xff] %v3806_v26 }
 0x1a1   : > { %v1635_v55 = vand.u32 2147483647, %v3650_v13  ;;  %2213 = vpow2.f32 %v1531_v49  ;;  %v1707_v50 = vsel %vm1451_vm0, %v3403_v40, %v1691_v57  ;;  %v1517_v19 = vmul.f32 1.442695, %v1496_v7 }
 0x1a2   : > { %v2198_v30 = vpop.eup %2197  ;;  %2215 = vlog2.f32 %v1638_v51  ;;  %v1208_v4 = vsel %vm3751_vm5, %v1205_v35, %v1202_v32  ;;  %v1572_v60 = vand.u32 2147483647, %v3669_v23  ;;  %v1212_v21 = vmul.f32 -0.5, %v3721_v31 }
 0x1a3   : > { %v3774_v33 = vpop.eup %2199  ;;  %2217 = vlog2.f32 %v1575_v36  ;;  %v4380_v49 = vmax.f32 %v3424_v9, 0.0  ;;  %v1570_v53 = vadd.f32 1.0, %v1569_v42  ;;  %v1481_v57 = vand.u32 2147483647, %v3764_v20 }
 0x1a4   : > { %v2202_v37 = vpop.eup %2201  ;;  %2219 = vpow2.f32 %v1517_v19  ;;  %vm1453_vm7 = vcmp.ne.f32.partialorder %v3487_v47, %v3487_v47  ;;  %v1631_v5 = vmul.f32 0.6931472, %v2198_v30  ;;  %v1634_v32 = vmul.f32 %v3650_v13, %v1633_v39 }
 0x1a5   : > { %v1311_v25 = vadd.f32 %v1271_v18, %v4380_v49  ;;  %v2204_v51 = vpop.eup %2203  ;;  %2221 = vtanh.f32 %v1707_v50  ;;  %vm3786_vm8 = vcmp.lt.f32.partialorder %v1635_v55, 0.0004427343  ;;  %v3793_v36 = vmul.f32 %v2196_v8, %v3286_v56  ;;  %v1023_v49 = vpop.xlane.xlu1 %1022 }
 0x1a6   : > { %v3790_v7 = vpop.eup %2205  ;;  %v4383_v42 = vmax.f32 %v3444_v17, 0.0  ;;  %v1275_v50 = vmul.f32 -0.5, %v3717_v54  ;;  %v1281_v19 = vadd.f32 1.0, %v3774_v33  ;;  %v3800_v30 = vmul.f32 %v2202_v37, %v3315_v15 }
 0x1a7   : > { %vm3802_vm9 = vcmp.lt.f32.partialorder %v1572_v60, 0.0004427343  ;;  %v1213_v13 = vadd.f32 1.0, %v1212_v21  ;;  %v1497_v39 = vsub.f32 0.0, %v1481_v57  ;;  %v1327_v56 = vsel %vm1071_vm4, %v3424_v9, %v1311_v25 }
 0x1a8   : > { %v1304_v18 = vadd.f32 %v1208_v4, %v4383_v42  ;;  %v1568_v8 = vmul.f32 0.6931472, %v2204_v51  ;;  %v1571_v4 = vmul.f32 %v3669_v23, %v1570_v53  ;;  %v1215_v42 = vand.u32 2147483647, %v3721_v31 }
 0x1a9   : > { %v1637_v15 = vsel %vm3786_vm8, %v1634_v32, %v1631_v5  ;;  %v1641_v60 = vmul.f32 -0.5, %v3730_v11  ;;  %v1519_v37 = vmul.f32 1.442695, %v1497_v39  ;;  %v3818_v21 = vadd.f32 %v1023_v49, %v2821_v1 }
 0x1aa   : > { %v2208_v57 = vpop.eup %2207  ;;  %v1320_v25 = vsel %vm1064_vm6, %v3444_v17, %v1304_v18  ;;  %vm1446_vm10 = vcmp.ne.f32.partialorder %v3503_v2, %v3503_v2  ;;  %v1276_v53 = vadd.f32 1.0, %v1275_v50  ;;  %v1278_v23 = vand.u32 2147483647, %v3717_v54 }
 0x1ab   : > { %2223 = vlog2.f32 %v1281_v19  ;;  %vm1065_vm11 = vcmp.ne.f32.partialorder %v3557_v6, %v3557_v6  ;;  %v1211_v51 = vmul.f32 0.6931472, %v2208_v57  ;;  %v1214_v5 = vmul.f32 %v3721_v31, %v1213_v13  ;;  %v3831_v35 = vpop.eup %2209  ;;  %v1020_v57 = vpop.xlane.xlu0 %1019 }
 0x1ac   : > { %v1578_v32 = vmul.f32 -0.5, %v3756_v52  ;;  %2225 = vpow2.f32 %v1519_v37  ;;  %v4387_v18 = vmax.f32 %v3487_v47, 0.0  ;;  %vm3835_vm12 = vcmp.lt.f32.partialorder %v1215_v42, 0.0004427343  ;;  %v2212_v26 = vpop.eup %2211 }
 0x1ad   : > { %v1489_v19 = vand.u32 2147483647, %v3818_v21  ;;  %2227 = vtanh.f32 %v1327_v56  ;;  %v1574_v31 = vsel %vm3802_vm9, %v1571_v4, %v1568_v8  ;;  %v1642_v13 = vadd.f32 1.0, %v1641_v60 }
 0x1ae   : > { %v1693_v49 = vadd.f32 %v1637_v15, %v4387_v18  ;;  %v1644_v37 = vand.u32 2147483647, %v3730_v11  ;;  %v3844_v9 = vpop.eup %2213  ;;  %2229 = vtanh.f32 %v1320_v25  ;;  %v1277_v42 = vmul.f32 %v3717_v54, %v1276_v53 }
 0x1af   : > { %vm3847_vm13 = vcmp.lt.f32.partialorder %v1278_v23, 0.0004427343  ;;  %v2216_v50 = vpop.eup %2215  ;;  %v1217_v55 = vsel %vm3835_vm12, %v1214_v5, %v1211_v51  ;;  %v1579_v56 = vadd.f32 1.0, %v1578_v32  ;;  %v1647_v8 = vadd.f32 1.0, %v3844_v9 }
 0x1b0   : > { %v1505_v4 = vsub.f32 0.0, %v1489_v19  ;;  %v2218_v60 = vpop.eup %2217  ;;  %v1709_v54 = vsel %vm1453_vm7, %v3487_v47, %v1693_v49  ;;  %v4392_v25 = vmax.f32 %v3503_v2, 0.0  ;;  %v1581_v23 = vand.u32 2147483647, %v3756_v52 }
 0x1b1   : > { %v3863_v18 = vadd.f32 %v1020_v57, %v2821_v1  ;;  %v3865_v39 = vpop.eup %2219  ;;  %v1274_v51 = vmul.f32 0.6931472, %v2212_v26  ;;  %v1643_v5 = vmul.f32 %v3730_v11, %v1642_v13  ;;  %vm3868_vm14 = vcmp.lt.f32.partialorder %v1644_v37, 0.0004427343 }
 0x1b2   : > { %v1686_v53 = vadd.f32 %v1574_v31, %v4392_v25  ;;  %v1284_v19 = vmul.f32 -0.5, %v3774_v33  ;;  %v3873_v49 = vpop.eup %2221  ;;  %v4395_v31 = vmax.f32 %v3557_v6, 0.0  ;;  %v1640_v47 = vmul.f32 0.6931472, %v2216_v50 }
 0x1b3   : > { %v1650_v57 = vmul.f32 -0.5, %v3844_v9  ;;  %v1584_v1 = vadd.f32 1.0, %v3865_v39  ;;  %vm1447_vm15 = vcmp.ne.f32.partialorder %v3622_v46, %v3622_v46  ;;  %v1577_v11 = vmul.f32 0.6931472, %v2218_v60 }
 0x1b4   : > { %v1305_v25 = vadd.f32 %v1217_v55, %v4395_v31  ;;  %v1580_v26 = vmul.f32 %v3756_v52, %v1579_v56  ;;  %2231 = vlog2.f32 %v1647_v8  ;;  %v1535_v13 = vmul.f32 1.442695, %v1505_v4 }
 0x1b5   : > { %vm3882_vm0 = vcmp.lt.f32.partialorder %v1581_v23, 0.0004427343  ;;  %v1287_v45 = vand.u32 2147483647, %v3774_v33  ;;  %2233 = vlog2.f32 %v1584_v1  ;;  %v1488_v50 = vand.u32 2147483647, %v3863_v18 }
 0x1b6   : > { %2235 = vtanh.f32 %v1709_v54  ;;  %v1702_v55 = vsel %vm1446_vm10, %v3503_v2, %v1686_v53  ;;  %v1280_v52 = vsel %vm3847_vm13, %v1277_v42, %v1274_v51  ;;  %v1285_v56 = vadd.f32 1.0, %v1284_v19 }
 0x1b7   : > { %v1321_v8 = vsel %vm1065_vm11, %v3557_v6, %v1305_v25  ;;  %v1646_v1 = vsel %vm3868_vm14, %v1643_v5, %v1640_v47  ;;  %v1651_v4 = vadd.f32 1.0, %v1650_v57  ;;  %v1653_v60 = vand.u32 2147483647, %v3844_v9 }
 0x1b8   : > { %v2224_v54 = vpop.eup %2223  ;;  %vm1072_vm1 = vcmp.ne.f32.partialorder %v3552_v29, %v3552_v29  ;;  %vm1454_vm3 = vcmp.ne.f32.partialorder %v3561_v34, %v3561_v34  ;;  %v1583_v42 = vsel %vm3882_vm0, %v1580_v26, %v1577_v11  ;;  %v1587_v15 = vmul.f32 -0.5, %v3865_v39 }
 0x1b9   : > { %2237 = vpow2.f32 %v1535_v13  ;;  %v1504_v53 = vsub.f32 0.0, %v1488_v50  ;;  %v3908_v23 = vpop.eup %2225  ;;  %v4398_v47 = vmax.f32 %v3552_v29, 0.0  ;;  %vm3912_vm4 = vcmp.lt.f32.partialorder %v1287_v45, 0.0004427343 }
 0x1ba   : > { %2239 = vtanh.f32 %v1702_v55  ;;  %v1432_v32 = vmax.f32 %v3709_v16, 0.0  ;;  %v4401_v19 = vmax.f32 %v3561_v34, 0.0  ;;  %v1286_v25 = vmul.f32 %v3774_v33, %v1285_v56  ;;  %v3923_v26 = vpop.eup %2227 }
 0x1bb   : > { %v1312_v51 = vadd.f32 %v1280_v52, %v4398_v47  ;;  %v1593_v57 = vadd.f32 1.0, %v3908_v23  ;;  %v772_v11 = vmul.f32 %v3277_v22, %v2864_v24  ;;  %2241 = vtanh.f32 %v1321_v8  ;;  %v3927_v55 = vpop.eup %2229 }
 0x1bc   : > { %v1694_v31 = vadd.f32 %v1646_v1, %v4401_v19  ;;  %v4402_v45 = vmax.f32 %v3622_v46, 0.0  ;;  %v1283_v37 = vmul.f32 0.6931472, %v2224_v54  ;;  %v1533_v50 = vmul.f32 1.442695, %v1504_v53 }
 0x1bd   : > { %v1652_v52 = vmul.f32 %v3844_v9, %v1651_v4  ;;  %vm3930_vm5 = vcmp.lt.f32.partialorder %v1653_v60, 0.0004427343  ;;  %v1588_v33 = vadd.f32 1.0, %v1587_v15  ;;  %v1590_v56 = vand.u32 2147483647, %v3865_v39 }
 0x1be   : > { %v1687_v13 = vadd.f32 %v1583_v42, %v4402_v45  ;;  %vm1073_vm6 = vcmp.ne.f32.partialorder %v3638_v48, %v3638_v48  ;;  %vm1448_vm7 = vcmp.ne.f32.partialorder %v3709_v16, %v3709_v16  ;;  %2243 = vlog2.f32 %v1593_v57 }
 0x1bf   : > { %v773_v24 = vmul.f32 %v3333_v12, %v2883_v27  ;;  %v774_v22 = vmul.f32 %v3361_v0, %v2900_v28  ;;  %vm865_vm8 = vcmask 1041409   ;;  %vm1455_vm9 = vcmp.ne.f32.partialorder %v3675_v61, %v3675_v61 }
 0x1c0   : > { %2245 = vpow2.f32 %v1533_v50  ;;  %v816_v9 = vrot.slane %v3179_v63, %v2724_v58  ;;  %v4405_v8 = vrot.slane %v3118_v44, %v2724_v58  ;;  %v4406_v4 = vrot.slane %v3136_v59, %v2724_v58 }
 0x1c1   : > { %vm867_vm10 = vcmask 1042434   ;;  %v1703_v27 = vsel %vm1447_vm15, %v3622_v46, %v1687_v13  ;;  %v1289_v28 = vsel %vm3912_vm4, %v1286_v25, %v1283_v37  ;;  %v820_v63 = vrot.slane %v3236_v14, %v2724_v58  ;;  %v2232_v0 = vpop.eup %2231 }
 0x1c2   : > { %v866_v60 = vsel %vm865_vm8, %v4406_v4, %v4405_v8  ;;  %vm869_vm11 = vcmask 1043459   ;;  %v1589_v44 = vmul.f32 %v3865_v39, %v1588_v33  ;;  %vm3963_vm12 = vcmp.lt.f32.partialorder %v1590_v56, 0.0004427343  ;;  %v2234_v53 = vpop.eup %2233 }
 0x1c3   : > { %v824_v59 = vrot.slane %v772_v11, %v2724_v58  ;;  %vm871_vm13 = vcmask 1044484   ;;  %v1596_v54 = vmul.f32 -0.5, %v3908_v23  ;;  %v828_v42 = vrot.slane %v773_v24, %v2724_v58  ;;  %v3976_v19 = vpop.eup %2235 }
 0x1c4   : > { %v4409_v15 = vrot.slane %v3100_v10, %v2724_v58  ;;  %vm873_vm14 = vcmask 1045509   ;;  %v1649_v39 = vmul.f32 0.6931472, %v2232_v0  ;;  %v832_v47 = vrot.slane %v774_v22, %v2724_v58  ;;  %v4425_v0 = vld [vmem:[#allocation16_spill] sm:$0xff] }
 0x1c5   : > { %vm875_vm15 = vcmask 1046534   ;;  %v1328_v25 = vsel %vm1072_vm1, %v3552_v29, %v1312_v51  ;;  %v1710_v10 = vsel %vm1454_vm3, %v3561_v34, %v1694_v31  ;;  %v1586_v57 = vmul.f32 0.6931472, %v2234_v53 }
 0x1c6   : > { %v868_v14 = vsel %vm867_vm10, %v4409_v15, %v866_v60  ;;  %2247 = vtanh.f32 %v1703_v27  ;;  %v4410_v45 = vmax.f32 %v3638_v48, 0.0  ;;  %v1655_v37 = vsel %vm3930_vm5, %v1652_v52, %v1649_v39  ;;  %v3992_v33 = vpop.eup %2237  ;;  %v4414_v39 = vld [vmem:[#allocation20_spill] sm:$0xff] }
 0x1c7   : > { %v870_v5 = vsel %vm869_vm11, %v816_v9, %v868_v14  ;;  %v4411_v51 = vmax.f32 %v3675_v61, 0.0  ;;  %v1592_v31 = vsel %vm3963_vm12, %v1589_v44, %v1586_v57  ;;  %v1597_v24 = vadd.f32 1.0, %v1596_v54  ;;  %v2240_v9 = vpop.eup %2239  ;;  %v4415_v57 = vld [vmem:[#allocation13_spill] sm:$0xff] }
 0x1c8   : > { %v872_v11 = vsel %vm871_vm13, %v820_v63, %v870_v5  ;;  %v1313_v13 = vadd.f32 %v1289_v28, %v4410_v45  ;;  %v1688_v8 = vadd.f32 %v1592_v31, %v1432_v32  ;;  %v1599_v4 = vand.u32 2147483647, %v3908_v23  ;;  %v2242_v28 = vpop.eup %2241 }
 0x1c9   : > { %v874_v50 = vsel %vm873_vm14, %v824_v59, %v872_v11  ;;  %v1695_v56 = vadd.f32 %v1655_v37, %v4411_v51  ;;  %vm888_vm0 = vcmask 56320   ;;  %v4003_v52 = vmul.f32 %v3790_v7, %v3307_v62  ;;  %v4416_v11 = vld [vmem:[#allocation24_spill] sm:$0xff]  ;;  %v4418_v37 = vld [vmem:[#allocation22_spill] sm:$0xff]  ;;  %v4419_v51 = vld [vmem:[#allocation17_spill] sm:$0xff] }
 0x1ca   : > { %v876_v22 = vsel %vm875_vm15, %v828_v42, %v874_v50  ;;  %v1766_v60 = vrot.slane %v3793_v36, 5  ;;  %2249 = vtanh.f32 %v1328_v25  ;;  %v1665_v27 = vadd.f32 1.0, %v3992_v33 }
 0x1cb   : > { %v878_v1 = vsel %vm877_vm2, %v832_v47, %v876_v22  ;;  %v4009_v63 = vmul.f32 %v3831_v35, %v3359_v38  ;;  %2251 = vtanh.f32 %v1710_v10  ;;  %v1329_v32 = vsel %vm1073_vm6, %v3638_v48, %v1313_v13  ;;  %v2244_v44 = vpop.eup %2243  ;;  %v4417_v13 = vld [vmem:[#allocation12_spill] sm:$0xff]  ;;  %v4420_v22 = vld [vmem:[#allocation18_spill] sm:$0xff] }
 0x1cc   : > { %v1704_v62 = vsel %vm1448_vm7, %v3709_v16, %v1688_v8  ;;  %v1711_v7 = vsel %vm1455_vm9, %v3675_v61, %v1695_v56  ;;  %v1598_v38 = vmul.f32 %v3908_v23, %v1597_v24  ;;  %v889_v35 = vsel %vm888_vm0, %v878_v1, -inf  ;;  %v4421_v1 = vld [vmem:[#allocation14_spill] sm:$0xff] }
 0x1cd   : > { %2253 = vtanh.f32 %v1704_v62  ;;  %v1397_v12 = vrot.slane %v3800_v30, 5  ;;  %v1433_v59 = vmax.f32 %v3764_v20, 0.0  ;;  %vm4027_vm1 = vcmp.lt.f32.partialorder %v1599_v4, 0.0004427343  ;;  %890 = vmax.xlane.f32.xlu0 %v889_v35  ;;  %v4031_v54 = vpop.eup %2245 }
 0x1ce   : > { %2255 = vlog2.f32 %v1665_v27  ;;  %v4034_v42 = vmul.f32 %v2240_v9, %v3503_v2  ;;  %v1595_v23 = vmul.f32 0.6931472, %v2244_v44  ;;  %v1668_v15 = vmul.f32 -0.5, %v3992_v33 }
 0x1cf   : > { %2257 = vtanh.f32 %v1329_v32  ;;  %v1778_v14 = vrot.slane %v4009_v63, 6  ;;  %v1656_v53 = vadd.f32 1.0, %v4031_v54  ;;  %v780_v47 = vmul.f32 %v4414_v39, %v2942_v41  ;;  %v4423_v32 = vld [vmem:[#allocation15_spill] sm:$0xff] }
 0x1d0   : > { %2259 = vtanh.f32 %v1711_v7  ;;  %v4043_v5 = vmul.f32 %v3873_v49, %v3403_v40  ;;  %vm1449_vm3 = vcmp.ne.f32.partialorder %v3764_v20, %v3764_v20  ;;  %v1601_v2 = vsel %vm4027_vm1, %v1598_v38, %v1595_v23 }
 0x1d1   : > { %v1441_v25 = vmax.f32 %v3818_v21, 0.0  ;;  %v1689_v10 = vadd.f32 %v1601_v2, %v1433_v59  ;;  %2261 = vlog2.f32 %v1656_v53  ;;  %v781_v45 = vmul.f32 %v4416_v11, %v4415_v57  ;;  %v4428_v53 = vld [vmem:[#allocation25_spill] sm:$0xff] }
 0x1d2   : > { %v782_v41 = vmul.f32 %v4418_v37, %v4417_v13  ;;  %v1768_v50 = vrot.slane %v4034_v42, 4  ;;  %v1669_v40 = vadd.f32 1.0, %v1668_v15  ;;  %v1671_v49 = vand.u32 2147483647, %v3992_v33  ;;  %v4427_v15 = vld [vmem:[#allocation26_spill] sm:$0xff] }
 0x1d3   : > { %v848_v56 = vrot.slane %v4419_v51, %v2724_v58  ;;  %v1705_v31 = vsel %vm1449_vm3, %v3764_v20, %v1689_v10  ;;  %v1659_v24 = vmul.f32 -0.5, %v4031_v54  ;;  %v852_v9 = vrot.slane %v4420_v22, %v2724_v58  ;;  %v2248_v4 = vpop.eup %2247  ;;  %v4430_v10 = vld [vmem:[#allocation23_spill] sm:$0xff] }
 0x1d4   : > { %v856_v8 = vrot.slane %v780_v47, %v2724_v58  ;;  %2263 = vtanh.f32 %v1705_v31  ;;  %v4422_v27 = vrot.slane %v4421_v1, %v2724_v58  ;;  %v4424_v62 = vrot.slane %v4423_v32, %v2724_v58  ;;  %v4436_v1 = vld [vmem:[#allocation30_spill] sm:$0xff] }
 0x1d5   : > { %v1352_v38 = vmul.f32 %v3927_v55, %v3444_v17  ;;  %v1353_v35 = vmul.f32 %v2242_v28, %v3557_v6  ;;  %v860_v44 = vrot.slane %v781_v45, %v2724_v58  ;;  %v864_v59 = vrot.slane %v782_v41, %v2724_v58 }
 0x1d6   : > { %v879_v7 = vsel %vm865_vm8, %v4424_v62, %v4422_v27  ;;  %v4426_v42 = vrot.slane %v4425_v0, %v2724_v58  ;;  %v4429_v39 = vrot.slane %v4428_v53, 7  ;;  %v4431_v17 = vrot.slane %v4430_v10, 6 }
 0x1d7   : > { %v1385_v55 = vrot.slane %v4003_v52, 4  ;;  %v1387_v28 = vrot.slane %v1352_v38, 3  ;;  %v2250_v57 = vpop.eup %2249  ;;  %v1735_v11 = vmul.f32 %v2248_v4, %v3622_v46  ;;  %v4432_v45 = vrot.slane %v3657_v3, 5 }
 0x1d8   : > { %v880_v23 = vsel %vm867_vm10, %v4426_v42, %v879_v7  ;;  %v1380_v47 = vsel %vm865_vm8, %v4429_v39, %v4427_v15  ;;  %v1389_v37 = vrot.slane %v1353_v35, 2  ;;  %v2252_v41 = vpop.eup %2251  ;;  %v1670_v51 = vmul.f32 %v3992_v33, %v1669_v40  ;;  %v4438_v7 = vld [vmem:[#allocation19_spill] sm:$0xff]  ;;  %v4439_v42 = vld [vmem:[#allocation21_spill] sm:$0xff] }
 0x1d9   : > { %v881_v2 = vsel %vm869_vm11, %v848_v56, %v880_v23  ;;  %v1382_v6 = vsel %vm867_vm10, %v4431_v17, %v1380_v47  ;;  %vm4094_vm4 = vcmp.lt.f32.partialorder %v1671_v49, 0.0004427343  ;;  %v1660_v46 = vadd.f32 1.0, %v1659_v24 }
 0x1da   : > { %v882_v58 = vsel %vm871_vm13, %v852_v9, %v881_v2  ;;  %v1384_v13 = vsel %vm869_vm11, %v4432_v45, %v1382_v6  ;;  %v2254_v22 = vpop.eup %2253  ;;  %v4435_v4 = vrot.slane %v3701_v43, 7  ;;  %v4437_v27 = vrot.slane %v4436_v1, 6 }
 0x1db   : > { %v883_v52 = vsel %vm873_vm14, %v856_v8, %v882_v58  ;;  %v1386_v31 = vsel %vm871_vm13, %v1385_v55, %v1384_v13  ;;  %v2256_v40 = vpop.eup %2255  ;;  %v1662_v49 = vand.u32 2147483647, %v4031_v54  ;;  %v1736_v24 = vmul.f32 %v2254_v22, %v3709_v16 }
 0x1dc   : > { %v884_v9 = vsel %vm875_vm15, %v860_v44, %v883_v52  ;;  %v1388_v3 = vsel %vm873_vm14, %v1387_v28, %v1386_v31  ;;  %v1765_v33 = vsel %vm865_vm8, %v4437_v27, %v4435_v4  ;;  %v2258_v62 = vpop.eup %2257  ;;  %v1359_v38 = vmul.f32 %v3923_v26, %v4438_v7 }
 0x1dd   : > { %v885_v32 = vsel %vm877_vm2, %v864_v59, %v884_v9  ;;  %v4110_v8 = vsel %vm875_vm15, %v1389_v37, %v1388_v3  ;;  %v1770_v35 = vrot.slane %v1735_v11, 3  ;;  %v1667_v43 = vmul.f32 0.6931472, %v2256_v40  ;;  %v2260_v0 = vpop.eup %2259  ;;  %v4441_v11 = vld [vmem:[#allocation27_spill] sm:$0xff] }
 0x1de   : > { %v892_v44 = vsel %vm888_vm0, %v885_v32, -inf  ;;  %v1741_v23 = vmul.f32 %v3976_v19, %v4439_v42  ;;  %vm1457_vm5 = vcmp.ne.f32.partialorder %v3818_v21, %v3818_v21  ;;  %v1440_v59 = vmax.f32 %v3863_v18, 0.0  ;;  %v2262_v47 = vpop.eup %2261 }
 0x1df   : > { %893 = vmax.xlane.f32.xlu1 %v892_v44  ;;  %v1767_v16 = vsel %vm867_vm10, %v1766_v60, %v1765_v33  ;;  %v1673_v26 = vsel %vm4094_vm4, %v1670_v51, %v1667_v43  ;;  %v1661_v15 = vmul.f32 %v4031_v54, %v1660_v46  ;;  %v1772_v39 = vrot.slane %v1736_v24, 2  ;;  %v4443_v51 = vld [vmem:[#allocation28_spill] sm:$0xff]  ;;  %v1002_v44 = vpop.xlane.xlu0 %1001 }
 0x1e0   : > { %v1769_v53 = vsel %vm869_vm11, %v1768_v50, %v1767_v16  ;;  %v1742_v19 = vmul.f32 %v2252_v41, %v3561_v34  ;;  %v1697_v2 = vadd.f32 %v1673_v26, %v1441_v25  ;;  %vm1663_vm6 = vcmp.lt.f32.partialorder %v1662_v49, 0.0004427343  ;;  %v4447_v16 = vld [vmem:[#allocation32_spill] sm:$0xff] }
 0x1e1   : > { %v1360_v10 = vmul.f32 %v2250_v57, %v3552_v29  ;;  %v1743_v36 = vmul.f32 %v2260_v0, %v3675_v61  ;;  %v1658_v60 = vmul.f32 0.6931472, %v2262_v47  ;;  %v1771_v17 = vsel %vm871_vm13, %v1770_v35, %v1769_v53  ;;  %v2264_v25 = vpop.eup %2263  ;;  %v4446_v35 = vld [vmem:[#allocation29_spill] sm:$0xff] }
 0x1e2   : > { %v1361_v6 = vmul.f32 %v2258_v62, %v3638_v48  ;;  %v1777_v54 = vrot.slane %v4043_v5, 7  ;;  %v1780_v50 = vrot.slane %v1741_v23, 5  ;;  %v1713_v34 = vsel %vm1457_vm5, %v3818_v21, %v1697_v2  ;;  %v4440_v5 = vld [vmem:[#allocation31_spill] sm:$0xff] }
 0x1e3   : > { %vm1456_vm7 = vcmp.ne.f32.partialorder %v3863_v18, %v3863_v18  ;;  %2265 = vtanh.f32 %v1713_v34  ;;  %v1664_v29 = vsel %vm1663_vm6, %v1661_v15, %v1658_v60  ;;  %v1773_v61 = vsel %vm873_vm14, %v1772_v39, %v1771_v17  ;;  %v1026_v15 = vpop.xlane.xlu1 %1025 }
 0x1e4   : > { %v1399_v55 = vrot.slane %v1359_v38, 4  ;;  %v1696_v28 = vadd.f32 %v1664_v29, %v1440_v59  ;;  %v1737_v48 = vmul.f32 %v2264_v25, %v3764_v20  ;;  %v1401_v57 = vrot.slane %v1360_v10, 3  ;;  %v4445_v38 = vld [vmem:[#allocation11_spill] sm:$0xff] }
 0x1e5   : > { %v4442_v58 = vrot.slane %v4441_v11, 7  ;;  %v1782_v13 = vrot.slane %v1742_v19, 4  ;;  %v1784_v37 = vrot.slane %v1743_v36, 3  ;;  %v1403_v41 = vrot.slane %v1361_v6, 2 }
 0x1e6   : > { %v4444_v56 = vrot.slane %v4443_v51, 6  ;;  %v1712_v31 = vsel %vm1456_vm7, %v3863_v18, %v1696_v28  ;;  %v1774_v22 = vrot.slane %v1737_v48, 1  ;;  %v1779_v46 = vsel %vm865_vm8, %v1778_v14, %v1777_v54 }
 0x1e7   : > { %v1394_v45 = vsel %vm865_vm8, %v4442_v58, %v4440_v5  ;;  %2267 = vtanh.f32 %v1712_v31  ;;  %v1781_v1 = vsel %vm867_vm10, %v1780_v50, %v1779_v46  ;;  %v2411_v63 = vmov 0  }
 0x1e8   : > { %v1396_v52 = vsel %vm867_vm10, %v4444_v56, %v1394_v45  ;;  %v4160_v3 = vsel %vm875_vm15, %v1774_v22, %v1773_v61  ;;  %v1783_v30 = vsel %vm869_vm11, %v1782_v13, %v1781_v1  ;;  %2003 = vset.pattern.permute.xlu0 %v2411_v63  ;;  %2004 = vset.pattern.permute.xlu1 %v2411_v63  ;;  %vm1827_vm0 = vcmask 15360  }
 0x1e9   : > { %v1398_v20 = vsel %vm869_vm11, %v1397_v12, %v1396_v52  ;;  %v1785_v12 = vsel %vm871_vm13, %v1784_v37, %v1783_v30  ;;  %v4177_v43 = vadd.f32 %v4446_v35, %v4445_v38  ;;  %v4181_v42 = vadd.f32 %v1002_v44, %v4445_v38 }
 0x1ea   : > { %v1400_v9 = vsel %vm871_vm13, %v1399_v55, %v1398_v20  ;;  %v4186_v26 = vadd.f32 %v4447_v16, %v4445_v38  ;;  %v4190_v47 = vadd.f32 %v1026_v15, %v4445_v38 }
 0x1eb   : > { %v1402_v4 = vsel %vm873_vm14, %v1401_v57, %v1400_v9  ;;  %v1098_v0 = vand.u32 2147483647, %v4177_v43  ;;  %v1050_v37 = vmax.f32 %v4177_v43, 0.0  ;;  %vm1066_vm10 = vcmp.ne.f32.partialorder %v4177_v43, %v4177_v43 }
 0x1ec   : > { %v4165_v27 = vsel %vm875_vm15, %v1403_v41, %v1402_v4  ;;  %v1106_v39 = vand.u32 2147483647, %v4186_v26  ;;  %v1490_v2 = vand.u32 2147483647, %v4190_v47  ;;  %v1434_v20 = vmax.f32 %v4181_v42, 0.0 }
 0x1ed   : > { %vm1450_vm11 = vcmp.ne.f32.partialorder %v4181_v42, %v4181_v42 }
 0x1ee   : > { %v1122_v19 = vsub.f32 0.0, %v1106_v39  ;;  %v1506_v60 = vsub.f32 0.0, %v1490_v2 }
 0x1f0   : > { %v2266_v14 = vpop.eup %2265  ;;  %v1153_v10 = vmul.f32 1.442695, %v1122_v19  ;;  %v1537_v6 = vmul.f32 1.442695, %v1506_v60 }
 0x1f1   : > { %v1745_v33 = vmul.f32 %v2266_v14, %v3818_v21  ;;  %v1114_v21 = vsub.f32 0.0, %v1098_v0 }
 0x1f3   : > { %v1788_v32 = vrot.slane %v1745_v33, 1  ;;  %v1137_v23 = vmul.f32 1.442695, %v1114_v21  ;;  %v1442_v21 = vmax.f32 %v4190_v47, 0.0 }
 0x1f4   : > { %v2268_v40 = vpop.eup %2267 }
 0x1f5   : > { %v1744_v49 = vmul.f32 %v2268_v40, %v3863_v18  ;;  %v1482_v18 = vand.u32 2147483647, %v4181_v42  ;;  %2269 = vpow2.f32 %v1137_v23 }
 0x1f7   : > { %v1786_v24 = vrot.slane %v1744_v49, 2  ;;  %v1498_v59 = vsub.f32 0.0, %v1482_v18 }
 0x1f9   : > { %v1787_v62 = vsel %vm873_vm14, %v1786_v24, %v1785_v12  ;;  %v1521_v53 = vmul.f32 1.442695, %v1498_v59  ;;  %v1058_v24 = vmax.f32 %v4186_v26, 0.0  ;;  %vm1074_vm14 = vcmp.ne.f32.partialorder %v4186_v26, %v4186_v26 }
 0x1fa   : > { %v4173_v7 = vsel %vm875_vm15, %v1788_v32, %v1787_v62  ;;  %vm1458_vm15 = vcmp.ne.f32.partialorder %v4190_v47, %v4190_v47 }
 0x1fb   : > { %2271 = vpow2.f32 %v1521_v53 }
 0x1fc   : > { %2273 = vpow2.f32 %v1153_v10 }
 0x202   : > { %v2270_v36 = vpop.eup %2269 }
 0x203   : > { %v1218_v17 = vadd.f32 1.0, %v2270_v36  ;;  %v1221_v25 = vmul.f32 -0.5, %v2270_v36  ;;  %v1224_v28 = vand.u32 2147483647, %v2270_v36 }
 0x205   : > { %2275 = vlog2.f32 %v1218_v17  ;;  %v1222_v61 = vadd.f32 1.0, %v1221_v25  ;;  %vm1225_vm8 = vcmp.lt.f32.partialorder %v1224_v28, 0.0004427343 }
 0x206   : > { %2277 = vpow2.f32 %v1537_v6  ;;  %v1796_v6 = vstv %s1934_s29 }
 0x207   : > { %v1223_v11 = vmul.f32 %v2270_v36, %v1222_v61 }
 0x208   : > { %v2272_v54 = vpop.eup %2271 }
 0x209   : > { %v1602_v50 = vadd.f32 1.0, %v2272_v54  ;;  %v2274_v34 = vpop.eup %2273  ;;  %v1605_v57 = vmul.f32 -0.5, %v2272_v54  ;;  %v1608_v41 = vand.u32 2147483647, %v2272_v54 }
 0x20a   : > { %v1290_v29 = vadd.f32 1.0, %v2274_v34  ;;  %v1293_v22 = vmul.f32 -0.5, %v2274_v34  ;;  %v1296_v30 = vand.u32 2147483647, %v2274_v34 }
 0x20b   : > { %2279 = vlog2.f32 %v1602_v50  ;;  %v1606_v45 = vadd.f32 1.0, %v1605_v57  ;;  %vm1609_vm9 = vcmp.lt.f32.partialorder %v1608_v41, 0.0004427343 }
 0x20c   : > { %2281 = vlog2.f32 %v1290_v29  ;;  %v1294_v4 = vadd.f32 1.0, %v1293_v22  ;;  %vm1297_vm12 = vcmp.lt.f32.partialorder %v1296_v30, 0.0004427343 }
 0x20d   : > { %v1607_v52 = vmul.f32 %v2272_v54, %v1606_v45 }
 0x20e   : > { %v1295_v33 = vmul.f32 %v2274_v34, %v1294_v4 }
 0x212   : > { %v2276_v55 = vpop.eup %2275 }
 0x213   : > { %v2278_v48 = vpop.eup %2277  ;;  %v1220_v5 = vmul.f32 0.6931472, %v2276_v55 }
 0x214   : > { %v1674_v58 = vadd.f32 1.0, %v2278_v48  ;;  %v1677_v12 = vmul.f32 -0.5, %v2278_v48  ;;  %v1680_v62 = vand.u32 2147483647, %v2278_v48 }
 0x215   : > { %v1226_v51 = vsel %vm1225_vm8, %v1223_v11, %v1220_v5 }
 0x216   : > { %2283 = vlog2.f32 %v1674_v58  ;;  %v1306_v31 = vadd.f32 %v1226_v51, %v1050_v37  ;;  %v1678_v40 = vadd.f32 1.0, %v1677_v12  ;;  %vm1681_vm13 = vcmp.lt.f32.partialorder %v1680_v62, 0.0004427343 }
 0x218   : > { %v2280_v13 = vpop.eup %2279  ;;  %v1322_v9 = vsel %vm1066_vm10, %v4177_v43, %v1306_v31  ;;  %v1679_v44 = vmul.f32 %v2278_v48, %v1678_v40 }
 0x219   : > { %v1604_v56 = vmul.f32 0.6931472, %v2280_v13  ;;  %v2282_v1 = vpop.eup %2281  ;;  %2285 = vtanh.f32 %v1322_v9 }
 0x21a   : > { %v1292_v14 = vmul.f32 0.6931472, %v2282_v1 }
 0x21b   : > { %v1610_v46 = vsel %vm1609_vm9, %v1607_v52, %v1604_v56 }
 0x21c   : > { %v1690_v63 = vadd.f32 %v1610_v46, %v1434_v20  ;;  %v1298_v38 = vsel %vm1297_vm12, %v1295_v33, %v1292_v14 }
 0x21d   : > { %v1314_v0 = vadd.f32 %v1298_v38, %v1058_v24 }
 0x21e   : > { %v1706_v49 = vsel %vm1450_vm11, %v4181_v42, %v1690_v63 }
 0x21f   : > { %2287 = vtanh.f32 %v1706_v49  ;;  %v1330_v23 = vsel %vm1074_vm14, %v4186_v26, %v1314_v0 }
 0x220   : > { %2289 = vtanh.f32 %v1330_v23 }
 0x223   : > { %v2284_v32 = vpop.eup %2283 }
 0x224   : > { %v1676_v35 = vmul.f32 0.6931472, %v2284_v32 }
 0x226   : > { %v1682_v18 = vsel %vm1681_vm13, %v1679_v44, %v1676_v35  ;;  %v2286_v59 = vpop.eup %2285 }
 0x227   : > { %v1698_v16 = vadd.f32 %v1682_v18, %v1442_v21  ;;  %v1354_v15 = vmul.f32 %v2286_v59, %v4177_v43 }
 0x229   : > { %v1714_v53 = vsel %vm1458_vm15, %v4190_v47, %v1698_v16  ;;  %v1391_v19 = vrot.slane %v1354_v15, 1 }
 0x22a   : > { %2291 = vtanh.f32 %v1714_v53 }
 0x22b   : > { %v1392_v10 = vsel %vm877_vm2, %v1391_v19, %v4110_v8 }
 0x22c   : > { %v2288_v39 = vpop.eup %2287 }
 0x22d   : > { %v1738_v2 = vmul.f32 %v2288_v39, %v4181_v42  ;;  %v2290_v43 = vpop.eup %2289 }
 0x22e   : > { %v1362_v34 = vmul.f32 %v2290_v43, %v4186_v26  ;;  %v1935_v26 = vld [vmem:[%s4248_s3] ss:$0 sm:$0xff] }
 0x22f   : > { %v1776_v17 = vsel %vm877_vm2, %v1738_v2, %v4160_v3 }
 0x230   : > { %v1405_v29 = vrot.slane %v1362_v34, 1 }
 0x232   : > { %v1406_v8 = vsel %vm877_vm2, %v1405_v29, %v4165_v27  ;;  %v1936_v27 = vld [vmem:[%s4249_s4] ss:$0 sm:$0xff] }
 0x237   : > { %v2292_v25 = vpop.eup %2291 }
 0x238   : > { %v1746_v42 = vmul.f32 %v2292_v25, %v4190_v47 }
 0x23a   : > { %v1790_v3 = vsel %vm877_vm2, %v1746_v42, %v4173_v7 }
 0x256   : > { %v891_v36 = vpop.xlane.xlu0 %890 }
 0x257   : > { %v1409_v60 = vmax.f32 %v891_v36, %v1392_v10 }
 0x259   : > { %v1793_v54 = vmax.f32 %v1409_v60, %v1776_v17 }
 0x25b   : > { %v1797_v50 = vmax.f32 %v1793_v54, %v1796_v6 }
 0x25d   : > { %1802 = vperm.xlu0 %2003, %v1797_v50  }
 0x268   : > { %v894_v61 = vpop.xlane.xlu1 %893 }
 0x269   : > { %v1410_v55 = vmax.f32 %v894_v61, %v1406_v8 }
 0x26b   : > { %v1794_v28 = vmax.f32 %v1410_v55, %v1790_v3 }
 0x26d   : > { %v1798_v48 = vmax.f32 %v1794_v28, %v1796_v6 }
 0x26f   : > { %1807 = vperm.xlu1 %2004, %v1798_v48  }
 0x2d8   : > { %v1803_v47 = vpop.permute.xlu0 %1802 }
 0x2d9   : > { %v1816_v57 = vmul.f32 %v1935_v26, %v1803_v47 }
 0x2db   : > { %v1825_v7 = vadd.f32 %v1936_v27, %v1816_v57 }
 0x2dd   : > { %1828 = vst.msk [vmem:[%s272_s24] sm:$0xff] %vm1827_vm0, %v1825_v7 }
 0x2ea   : > { %v1808_v5 = vpop.permute.xlu1 %1807 }
 0x2eb   : > { %v1817_v11 = vmul.f32 %v1935_v26, %v1808_v5 }
 0x2ed   : > { %v1826_v58 = vadd.f32 %v1936_v27, %v1817_v11 }
 0x2ef   : > { %1829 = vst.msk [vmem:[%s272_s24 + $0x8] sm:$0xff] %vm1827_vm0, %v1826_v58 }
 0x2f0 PF: > { %p17_p3 = scmp.ge.s32.totalorder %s2462_s23, 6   ;;  %s4448_s18 = smov %s2396_s19 }
 0x2f1   : > { %s4449_s19 = smov %s2400_s20  ;;  %s4450_s20 = smov %s2472_s26 }
 0x2f2   : > { %s4451_s21 = smov %s2462_s23  ;;  %19 = sbr.rel (!%p17_p3) target bundleno = 5 (0x5), region = 89 }
 0x2f7   :  { %1852 = vsyncpa [#allocation3], 1 }
 0x2f8   :  { %1854 = vsyncpa [#allocation3 + $0x1], 1 }
 0x2f9   :  { %1855 = vsyncpa [#allocation6], 1 }
 0x2fa   :  { %1856 = vsyncpa [#allocation4], 1 }
 0x2fb   :  { %1858 = vsyncpa [#allocation4 + $0x1], 1 }

</bundles_post_ra>
